<compile_context>
chip_gen: v5e
topology: v5e:2x2
jax: 0.10.0
libtpu: 0.0.40
codegen_flags: <defaults>
</compile_context>

<pallas_src>
import functools

import numpy as np
import jax
import jax.numpy as jnp
from jax.experimental import pallas as pl
from jax.experimental.pallas import tpu as pltpu


# Explicit scoped-VMEM budget: safe on all generations (v7x physical = 64 MiB/TC),
# above the 16/32 MiB defaults so larger tiles never silently flip spill-bound.
_VMEM_LIMIT = 48 * 1024 * 1024


# ---------------------------------------------------------------------------
# Static token mask (mirror of get_token_mask_from_resolution_rectangle)
# ---------------------------------------------------------------------------
def get_token_mask(resolution, filter_ratio=1.0):
    max_res = int(max(resolution) / 2 * filter_ratio)
    freqs = []
    for i, res in enumerate(resolution):
        if i == 0:
            freqs.append(res * np.fft.rfftfreq(res))   # half-spectrum axis
        else:
            freqs.append(res * np.fft.fftfreq(res))
    grids = np.meshgrid(*freqs, indexing="ij")          # torch.meshgrid default 'ij'
    f2 = np.sum(np.stack(grids, 0) ** 2, 0)
    return f2 <= max_res ** 2


# ---------------------------------------------------------------------------
# Pointwise Pallas kernels (SN_MLP / output_mixer)
# ---------------------------------------------------------------------------
def _mlp_kernel(x_ref, w1_ref, b1_ref, w2_ref, b2_ref, o_ref):
    # SN_MLP (exp_factor=1): SigmaNormLinear -> GELU -> SigmaNormLinear
    # TODO(synk): SN_MLP source not provided; tanh-approx GELU assumed (PyTorch
    # nn.GELU default is the exact erf form — swap if the reference uses it).
    x = x_ref[...].astype(jnp.bfloat16)
    h = jnp.dot(x, w1_ref[...], preferred_element_type=jnp.float32) + b1_ref[...]
    h = jax.nn.gelu(h, approximate=True)
    o_ref[...] = (jnp.dot(h.astype(jnp.bfloat16), w2_ref[...],
                          preferred_element_type=jnp.float32) + b2_ref[...])


def _linear_kernel(x_ref, w_ref, b_ref, o_ref):
    # SigmaNormLinear output mixer
    o_ref[...] = (jnp.dot(x_ref[...].astype(jnp.bfloat16), w_ref[...],
                          preferred_element_type=jnp.float32) + b_ref[...])


def _expand_blockdiag(p, r):
    """Replicate a per-channel weight/bias r times for the lane-packing trick."""
    if r == 1:
        return p
    if p.shape[0] == 1:                                   # (1, C) bias -> (1, r*C)
        return jnp.tile(p, (1, r))
    return jnp.kron(jnp.eye(r, dtype=p.dtype), p)         # (C, C) -> block-diag (rC, rC)


def _run_pointwise(kernel, x2d, params, tn_max=1024):
    """Run a per-row kernel over (N, C) data, tiled along N.

    If C < 128 and divides 128, fold r = 128 // C rows into each kernel row with
    block-diagonal weights so both loads and stores are 128-lane dense.  The
    (N, C) -> (N/r, r*C) reshape is contiguous (free view), so no extra HBM traffic.
    """
    n, c = x2d.shape
    r = 1
    if c < 128 and 128 % c == 0 and n % (128 // c) == 0:
        r = 128 // c
    if r > 1:
        params = tuple(_expand_blockdiag(p, r) for p in params)
        x2d = x2d.reshape(n // r, r * c)

    rows, cols = x2d.shape
    tn = rows if rows <= tn_max else tn_max               # v6e/v5e: can raise tn_max
    in_specs = [pl.BlockSpec((tn, cols), lambda i: (i, 0))]
    in_specs += [pl.BlockSpec(p.shape, lambda i, nd=p.ndim: (0,) * nd) for p in params]
    out = pl.pallas_call(
        kernel,
        out_shape=jax.ShapeDtypeStruct((rows, cols), jnp.float32),
        grid_spec=pltpu.PrefetchScalarGridSpec(
            num_scalar_prefetch=0,
            grid=(pl.cdiv(rows, tn),),
            in_specs=in_specs,
            out_specs=pl.BlockSpec((tn, cols), lambda i: (i, 0)),
        ),
        compiler_params=pltpu.CompilerParams(
            dimension_semantics=("parallel",),
            vmem_limit_bytes=_VMEM_LIMIT),
    )(x2d, *params)
    return out.reshape(n, c) if r > 1 else out


# ---------------------------------------------------------------------------
# Spectral filter kernel (DSConvSpectralNd filter_generator + reconstruction)
# Data layout inside the kernel: (2C, T_tile) with rows [real | imag] stacked on
# the sublane axis and tokens on the lane axis.
# ---------------------------------------------------------------------------
def _make_spectral_kernel(n_tokens, c):
    # NOTE: ComplexLN is constructed as ComplexLN(hidden_dim, n_tokens),
    # i.e. eps == n_tokens — reproduced exactly (matches the PyTorch source).
    ln_eps = float(n_tokens)
    inv_bessel = 1.0 / float(c - 1)   # torch.std_mean default: unbiased (correction=1)
    inv_c = 1.0 / float(c)

    def kernel(x_ref, ln_w_ref, ln_br_ref, ln_bi_ref,
               w1r_ref, w1i_ref, b1r_ref, b1i_ref, modb_ref,
               w2r_ref, w2i_ref, b2r_ref, b2i_ref,
               magb_ref, cospb_ref, sinpb_ref,
               o_ref):
        # x_ref / o_ref are (2C, tT): rows 0..C-1 real, C..2C-1 imag.
        xr = x_ref[pl.ds(0, c), :]
        xi = x_ref[pl.ds(c, c), :]

        # --- ComplexLN over channels (sublane-axis reductions) ---
        mr = jnp.sum(xr, axis=0, keepdims=True) * inv_c
        mi = jnp.sum(xi, axis=0, keepdims=True) * inv_c
        dr = xr - mr
        di = xi - mi
        var = (jnp.sum(dr * dr, axis=0, keepdims=True)
               + jnp.sum(di * di, axis=0, keepdims=True)) * inv_bessel
        inv = pl.reciprocal(ln_eps + jnp.sqrt(var), approx=True)
        # cast to bf16 at the point of staging (halves copied bytes; MXU accum stays f32)
        nr = (dr * inv * ln_w_ref[...] + ln_br_ref[...]).astype(jnp.bfloat16)
        ni = (di * inv * ln_w_ref[...] + ln_bi_ref[...]).astype(jnp.bfloat16)

        # --- ComplexLinearDDP #1: split real/imag weights, no concat / no slicing ---
        w1r = w1r_ref[...]
        w1i = w1i_ref[...]
        hr = (jnp.dot(w1r, nr, preferred_element_type=jnp.float32)
              - jnp.dot(w1i, ni, preferred_element_type=jnp.float32) + b1r_ref[...])
        hi = (jnp.dot(w1i, nr, preferred_element_type=jnp.float32)
              + jnp.dot(w1r, ni, preferred_element_type=jnp.float32) + b1i_ref[...])

        # --- ModReLU: polar(relu(|z| + b), angle(z)) ---
        mag = jnp.sqrt(hr * hr + hi * hi)
        pos = mag > 0.0
        safe = jnp.where(pos, mag, 1.0)
        scale = jnp.maximum(mag + modb_ref[...], 0.0) * pl.reciprocal(safe, approx=True)
        hr = jnp.where(pos, hr, 1.0)                       # angle(0) == 0 in torch
        gr = (hr * scale).astype(jnp.bfloat16)
        gi = (hi * scale).astype(jnp.bfloat16)

        # --- ComplexLinearDDP #2 ---
        w2r = w2r_ref[...]
        w2i = w2i_ref[...]
        zr = (jnp.dot(w2r, gr, preferred_element_type=jnp.float32)
              - jnp.dot(w2i, gi, preferred_element_type=jnp.float32) + b2r_ref[...])
        zi = (jnp.dot(w2i, gr, preferred_element_type=jnp.float32)
              + jnp.dot(w2r, gi, preferred_element_type=jnp.float32) + b2i_ref[...])

        # --- filter_reconstruction: polar(sigmoid(|z|+mb), angle(z)+pb) ---
        zmag = jnp.sqrt(zr * zr + zi * zi)
        zpos = zmag > 0.0
        zsafe = jnp.where(zpos, zmag, 1.0)
        s = (jax.nn.sigmoid(zmag + magb_ref[...].astype(jnp.float32))
             * pl.reciprocal(zsafe, approx=True))
        zr = jnp.where(zpos, zr, 1.0)
        cpb = cospb_ref[...].astype(jnp.float32)
        spb = sinpb_ref[...].astype(jnp.float32)
        conv_r = s * (zr * cpb - zi * spb)
        conv_i = s * (zi * cpb + zr * spb)

        # --- x_masked * conv: re-read the input tile (short live ranges), and write
        #     with two sub-slice stores (no sublane concat copy) ---
        xr = x_ref[pl.ds(0, c), :]
        xi = x_ref[pl.ds(c, c), :]
        o_ref[pl.ds(0, c), :] = xr * conv_r - xi * conv_i
        o_ref[pl.ds(c, c), :] = xr * conv_i + xi * conv_r

    return kernel


def _run_spectral_filter(x2, p, n_tokens):
    b, c2, t = x2.shape
    c = c2 // 2

    # Lane-axis (token) tile: full dim when small, otherwise a multiple of 128.
    # 256 for moderate T creates >=2 token tiles (v7x megacore balance); capped at
    # 512 so double-buffered tiles + temporaries stay within v7x's smaller VMEM.
    if t <= 256:
        t_tile = t
    elif t <= 1024:
        t_tile = 256
    else:
        t_tile = 512
    nt = pl.cdiv(t, t_tile)
    kernel = _make_spectral_kernel(n_tokens, c)

    def const_spec(arr):
        return pl.BlockSpec(arr.shape, lambda j, i, nd=arr.ndim: (0,) * nd)

    # Grid = (token_tiles, batch): batch is the innermost axis so the per-token
    # constant tables (tok_spec) stay resident across all batches of a token tile.
    x_spec = pl.BlockSpec((pl.Squeezed(), c2, t_tile), lambda j, i: (i, 0, j))
    tok_spec = pl.BlockSpec((c, t_tile), lambda j, i: (0, j))

    consts = [p["ln_w"], p["ln_br"], p["ln_bi"],
              p["w1_r"], p["w1_i"], p["b1_r"], p["b1_i"], p["mod_b"],
              p["w2_r"], p["w2_i"], p["b2_r"], p["b2_i"]]
    in_specs = [x_spec] + [const_spec(a) for a in consts] + [tok_spec] * 3

    return pl.pallas_call(
        kernel,
        out_shape=jax.ShapeDtypeStruct((b, c2, t), jnp.float32),
        grid_spec=pltpu.PrefetchScalarGridSpec(
            num_scalar_prefetch=0,
            grid=(nt, b),
            in_specs=in_specs,
            out_specs=x_spec,
        ),
        compiler_params=pltpu.CompilerParams(
            dimension_semantics=("parallel", "parallel"),
            vmem_limit_bytes=_VMEM_LIMIT),
    )(x2, *consts, p["mag_bias"], p["cos_pb"], p["sin_pb"])


# ---------------------------------------------------------------------------
# ReFNOBlock forward
# ---------------------------------------------------------------------------
def refno_block(x, token_idx, params, n_tokens):
    b, h, w, c = x.shape

    # SN_MLP (pointwise over channels)
    xm = _run_pointwise(
        _mlp_kernel, x.reshape(-1, c),
        (params["mlp_w1"], params["mlp_b1"], params["mlp_w2"], params["mlp_b2"]))
    x = xm.reshape(b, h, w, c)

    # DSConvSpectralNd
    # TODO(synk): FFT has no Pallas primitive; rfftn/irfftn stay in plain JAX glue.
    # spatial_dims reversed -> rfft along axis 1 (H), full fft along axis 2 (W).
    x_ft = jnp.fft.rfftn(x, axes=(2, 1), norm="ortho")      # (B, H//2+1, W, C)
    hh = h // 2 + 1
    x_ft_flat = x_ft.reshape(b, hh * w, c)
    # TODO(synk): frequency-token gather/scatter and the complex pack/unpack
    # transposes are kept in XLA; fusing them into the spectral kernel via
    # scalar-prefetched DMA gather is left as future work.
    x_masked = jnp.take(x_ft_flat, token_idx, axis=1)        # (B, T, C) complex64

    # pack to (B, 2C, T): tokens on the lane axis, [real | imag] on the sublane axis
    x2 = jnp.concatenate(
        [jnp.transpose(jnp.real(x_masked), (0, 2, 1)),
         jnp.transpose(jnp.imag(x_masked), (0, 2, 1))], axis=1).astype(jnp.float32)

    y2 = _run_spectral_filter(x2, params, n_tokens)          # (B, 2C, T) f32
    y = jax.lax.complex(y2[:, :c, :], y2[:, c:, :])          # (B, C, T)
    y = jnp.transpose(y, (0, 2, 1)).astype(x_ft.dtype)       # (B, T, C)

    x_ft_new = jnp.zeros_like(x_ft_flat).at[:, token_idx, :].set(y)
    x_ft_new = x_ft_new.reshape(b, hh, w, c)
    x_sp = jnp.fft.irfftn(x_ft_new, s=(w, h), axes=(2, 1), norm="ortho")  # (B,H,W,C)

    # output_mixer (SigmaNormLinear)
    out = _run_pointwise(_linear_kernel, x_sp.reshape(-1, c),
                         (params["mix_w"], params["mix_b"]))
    return out.reshape(b, h, w, c)


# ---------------------------------------------------------------------------
# Deterministic parameter initialization
# ---------------------------------------------------------------------------
def init_params(key, dim, n_tokens):
    keys = jax.random.split(key, 20)
    scale = 1.0 / np.sqrt(dim)

    def dense(k):
        return scale * jax.random.normal(k, (dim, dim), jnp.float32)

    def row_bias(k):
        return scale * jax.random.normal(k, (1, dim), jnp.float32)

    def col_bias(k):
        return scale * jax.random.normal(k, (dim, 1), jnp.float32)

    def sigma_norm(wa):
        # TODO(synk): SN_MLP / SigmaNormLinear source is not in the provided module;
        # implemented as a Linear whose weight is scaled by its largest singular value.
        w_np = np.asarray(wa)
        sigma = np.linalg.svd(w_np, compute_uv=False)[0]
        return jnp.asarray(w_np / (sigma + 1e-12), jnp.float32)

    # filter biases from a synthetic complex tensor (like temp_conv in __init__),
    # stored transposed (C, n_tokens) and bf16 (phase bias pre-converted to cos/sin).
    tr = jax.random.normal(keys[16], (n_tokens, dim), jnp.float32)
    ti = jax.random.normal(keys[17], (n_tokens, dim), jnp.float32)
    mag_bias = jnp.sqrt(tr * tr + ti * ti).T
    phase = jnp.arctan2(ti, tr).T

    return dict(
        # SN_MLP (exp_factor=1): SigmaNormLinear -> GELU -> SigmaNormLinear
        mlp_w1=sigma_norm(dense(keys[0])).astype(jnp.bfloat16), mlp_b1=row_bias(keys[1]),
        mlp_w2=sigma_norm(dense(keys[2])).astype(jnp.bfloat16), mlp_b2=row_bias(keys[3]),
        # ComplexLN(hidden_dim, eps=n_tokens): weights=1, complex bias=0  (column vectors)
        ln_w=jnp.ones((dim, 1), jnp.float32),
        ln_br=jnp.zeros((dim, 1), jnp.float32),
        ln_bi=jnp.zeros((dim, 1), jnp.float32),
        # ComplexLinearDDP #1: pre-split real / imag weights (bf16) + real/imag biases
        w1_r=dense(keys[4]).astype(jnp.bfloat16), w1_i=dense(keys[5]).astype(jnp.bfloat16),
        b1_r=col_bias(keys[6]), b1_i=col_bias(keys[7]),
        # ModReLU
        mod_b=0.02 * jax.random.normal(keys[8], (dim, 1), jnp.float32),
        # ComplexLinearDDP #2
        w2_r=dense(keys[9]).astype(jnp.bfloat16), w2_i=dense(keys[10]).astype(jnp.bfloat16),
        b2_r=col_bias(keys[11]), b2_i=col_bias(keys[12]),
        # filter_reconstruction biases (largest streamed constants -> bf16)
        mag_bias=mag_bias.astype(jnp.bfloat16),
        cos_pb=jnp.cos(phase).astype(jnp.bfloat16),
        sin_pb=jnp.sin(phase).astype(jnp.bfloat16),
        # output_mixer SigmaNormLinear
        mix_w=sigma_norm(dense(keys[13])).astype(jnp.bfloat16),
        mix_b=row_bias(keys[14]),
    )


# ---------------------------------------------------------------------------
if __name__ == "__main__":
    B, H, W, C = 2, 16, 16, 8          # dim=8, resolution=(16, 16)
    resolution = (H, W)
    ratio = 1.0

    key = jax.random.PRNGKey(0)
    kx, kp = jax.random.split(key)
    x = jax.random.normal(kx, (B, H, W, C), jnp.float32)

    mask = get_token_mask(resolution, ratio)              # (H//2+1, W) bool
    token_idx = jnp.asarray(np.nonzero(mask.reshape(-1))[0], jnp.int32)
    n_tokens = int(mask.sum())

    params = init_params(kp, C, n_tokens)

    fwd = jax.jit(functools.partial(refno_block, params=params, n_tokens=n_tokens))
    out = fwd(x, token_idx)
    out = jax.block_until_ready(out)

    assert out.shape == (B, H, W, C), out.shape
    assert bool(jnp.all(jnp.isfinite(out)))
    print("KERNEL_OK")
</pallas_src>

<mosaic_0001>
module attributes {stable_mosaic.version = 11 : i64} {
  func.func @_mlp_kernel(%arg0: i32, %arg1: memref<32x128xf32, #tpu.memory_space<vmem>>, %arg2: memref<128x128xbf16, #tpu.memory_space<vmem>>, %arg3: memref<1x128xf32, #tpu.memory_space<vmem>>, %arg4: memref<128x128xbf16, #tpu.memory_space<vmem>>, %arg5: memref<1x128xf32, #tpu.memory_space<vmem>>, %arg6: memref<32x128xf32, #tpu.memory_space<vmem>>) attributes {dimension_semantics = [#tpu.dimension_semantics<parallel>], iteration_bounds = array<i64: 1>, scalar_prefetch = 0 : i64, scratch_operands = 0 : i64, tpu.core_type = #tpu.core_type<tc>, window_params = [{transform_indices = @transform_0, window_bounds = array<i64: 32, 128>}, {pipeline_mode = #tpu.pipeline_mode<synchronous>, transform_indices = @transform_1, window_bounds = array<i64: 128, 128>}, {pipeline_mode = #tpu.pipeline_mode<synchronous>, transform_indices = @transform_2, window_bounds = array<i64: 1, 128>}, {pipeline_mode = #tpu.pipeline_mode<synchronous>, transform_indices = @transform_3, window_bounds = array<i64: 128, 128>}, {pipeline_mode = #tpu.pipeline_mode<synchronous>, transform_indices = @transform_4, window_bounds = array<i64: 1, 128>}, {transform_indices = @transform_5, window_bounds = array<i64: 32, 128>}]} {
    %c0 = arith.constant 0 : index
    %c0_0 = arith.constant 0 : index
    %0 = vector.load %arg1[%c0, %c0_0] : memref<32x128xf32, #tpu.memory_space<vmem>>, vector<32x128xf32>
    %1 = arith.truncf %0 : vector<32x128xf32> to vector<32x128xbf16>
    %c0_1 = arith.constant 0 : index
    %c0_2 = arith.constant 0 : index
    %2 = vector.load %arg2[%c0_1, %c0_2] : memref<128x128xbf16, #tpu.memory_space<vmem>>, vector<128x128xbf16>
    %cst = arith.constant dense<0.000000e+00> : vector<32x128xf32>
    %3 = tpu.matmul %1, %2, %cst {dimension_numbers = #tpu.dot_dimension_numbers<[1], [0], [0], [1], [0, 0, 1, 1], [], []>} : vector<32x128xbf16>, vector<128x128xbf16>, vector<32x128xf32> -> vector<32x128xf32>
    %c0_3 = arith.constant 0 : index
    %c0_4 = arith.constant 0 : index
    %4 = vector.load %arg3[%c0_3, %c0_4] : memref<1x128xf32, #tpu.memory_space<vmem>>, vector<1x128xf32>
    %5 = vector.broadcast %4 : vector<1x128xf32> to vector<32x128xf32>
    %6 = arith.addf %3, %5 : vector<32x128xf32>
    %7 = arith.mulf %6, %6 : vector<32x128xf32>
    %8 = arith.mulf %6, %7 : vector<32x128xf32>
    %cst_5 = arith.constant 4.471500e-02 : f32
    %9 = vector.broadcast %cst_5 : f32 to vector<32x128xf32>
    %10 = arith.mulf %9, %8 : vector<32x128xf32>
    %11 = arith.addf %6, %10 : vector<32x128xf32>
    %cst_6 = arith.constant 0.797884583 : f32
    %12 = vector.broadcast %cst_6 : f32 to vector<32x128xf32>
    %13 = arith.mulf %12, %11 : vector<32x128xf32>
    %14 = math.tanh %13 : vector<32x128xf32>
    %cst_7 = arith.constant 1.000000e+00 : f32
    %15 = vector.broadcast %cst_7 : f32 to vector<32x128xf32>
    %16 = arith.addf %15, %14 : vector<32x128xf32>
    %cst_8 = arith.constant 5.000000e-01 : f32
    %17 = vector.broadcast %cst_8 : f32 to vector<32x128xf32>
    %18 = arith.mulf %17, %16 : vector<32x128xf32>
    %19 = arith.mulf %6, %18 : vector<32x128xf32>
    %20 = arith.truncf %19 : vector<32x128xf32> to vector<32x128xbf16>
    %c0_9 = arith.constant 0 : index
    %c0_10 = arith.constant 0 : index
    %21 = vector.load %arg4[%c0_9, %c0_10] : memref<128x128xbf16, #tpu.memory_space<vmem>>, vector<128x128xbf16>
    %cst_11 = arith.constant dense<0.000000e+00> : vector<32x128xf32>
    %22 = tpu.matmul %20, %21, %cst_11 {dimension_numbers = #tpu.dot_dimension_numbers<[1], [0], [0], [1], [0, 0, 1, 1], [], []>} : vector<32x128xbf16>, vector<128x128xbf16>, vector<32x128xf32> -> vector<32x128xf32>
    %c0_12 = arith.constant 0 : index
    %c0_13 = arith.constant 0 : index
    %23 = vector.load %arg5[%c0_12, %c0_13] : memref<1x128xf32, #tpu.memory_space<vmem>>, vector<1x128xf32>
    %24 = vector.broadcast %23 : vector<1x128xf32> to vector<32x128xf32>
    %25 = arith.addf %22, %24 : vector<32x128xf32>
    %c0_14 = arith.constant 0 : index
    %c0_15 = arith.constant 0 : index
    %26 = vector.load %arg6[%c0_14, %c0_15] : memref<32x128xf32, #tpu.memory_space<vmem>>, vector<32x128xf32>
    tpu.vector_store %arg6[%c0_14, %c0_15], %25 {strides = array<i32>} : memref<32x128xf32, #tpu.memory_space<vmem>>, vector<32x128xf32>,
    return
  }
  func.func @transform_0(%arg0: i32) -> (i32, i32) {
    %c0_i32 = arith.constant 0 : i32
    %c0_i32_0 = arith.constant 0 : i32
    return %arg0, %c0_i32 : i32, i32
  }
  func.func @transform_1(%arg0: i32) -> (i32, i32) {
    %c0_i32 = arith.constant 0 : i32
    %c0_i32_0 = arith.constant 0 : i32
    %c0_i32_1 = arith.constant 0 : i32
    return %c0_i32, %c0_i32_0 : i32, i32
  }
  func.func @transform_2(%arg0: i32) -> (i32, i32) {
    %c0_i32 = arith.constant 0 : i32
    %c0_i32_0 = arith.constant 0 : i32
    %c0_i32_1 = arith.constant 0 : i32
    return %c0_i32, %c0_i32_0 : i32, i32
  }
  func.func @transform_3(%arg0: i32) -> (i32, i32) {
    %c0_i32 = arith.constant 0 : i32
    %c0_i32_0 = arith.constant 0 : i32
    %c0_i32_1 = arith.constant 0 : i32
    return %c0_i32, %c0_i32_0 : i32, i32
  }
  func.func @transform_4(%arg0: i32) -> (i32, i32) {
    %c0_i32 = arith.constant 0 : i32
    %c0_i32_0 = arith.constant 0 : i32
    %c0_i32_1 = arith.constant 0 : i32
    return %c0_i32, %c0_i32_0 : i32, i32
  }
  func.func @transform_5(%arg0: i32) -> (i32, i32) {
    %c0_i32 = arith.constant 0 : i32
    %c0_i32_0 = arith.constant 0 : i32
    return %arg0, %c0_i32 : i32, i32
  }
}

module attributes {stable_mosaic.version = 11 : i64} {
  func.func @kernel(%arg0: i32, %arg1: i32, %arg2: memref<1x16x106xf32, #tpu.memory_space<vmem>>, %arg3: memref<8x1xf32, #tpu.memory_space<vmem>>, %arg4: memref<8x1xf32, #tpu.memory_space<vmem>>, %arg5: memref<8x1xf32, #tpu.memory_space<vmem>>, %arg6: memref<8x8xbf16, #tpu.memory_space<vmem>>, %arg7: memref<8x8xbf16, #tpu.memory_space<vmem>>, %arg8: memref<8x1xf32, #tpu.memory_space<vmem>>, %arg9: memref<8x1xf32, #tpu.memory_space<vmem>>, %arg10: memref<8x1xf32, #tpu.memory_space<vmem>>, %arg11: memref<8x8xbf16, #tpu.memory_space<vmem>>, %arg12: memref<8x8xbf16, #tpu.memory_space<vmem>>, %arg13: memref<8x1xf32, #tpu.memory_space<vmem>>, %arg14: memref<8x1xf32, #tpu.memory_space<vmem>>, %arg15: memref<8x106xbf16, #tpu.memory_space<vmem>>, %arg16: memref<8x106xbf16, #tpu.memory_space<vmem>>, %arg17: memref<8x106xbf16, #tpu.memory_space<vmem>>, %arg18: memref<1x16x106xf32, #tpu.memory_space<vmem>>) attributes {dimension_semantics = [#tpu.dimension_semantics<parallel>, #tpu.dimension_semantics<parallel>], iteration_bounds = array<i64: 1, 2>, scalar_prefetch = 0 : i64, scratch_operands = 0 : i64, tpu.core_type = #tpu.core_type<tc>, window_params = [{transform_indices = @transform_0, window_bounds = array<i64: 1, 16, 106>}, {pipeline_mode = #tpu.pipeline_mode<synchronous>, transform_indices = @transform_1, window_bounds = array<i64: 8, 1>}, {pipeline_mode = #tpu.pipeline_mode<synchronous>, transform_indices = @transform_2, window_bounds = array<i64: 8, 1>}, {pipeline_mode = #tpu.pipeline_mode<synchronous>, transform_indices = @transform_3, window_bounds = array<i64: 8, 1>}, {pipeline_mode = #tpu.pipeline_mode<synchronous>, transform_indices = @transform_4, window_bounds = array<i64: 8, 8>}, {pipeline_mode = #tpu.pipeline_mode<synchronous>, transform_indices = @transform_5, window_bounds = array<i64: 8, 8>}, {pipeline_mode = #tpu.pipeline_mode<synchronous>, transform_indices = @transform_6, window_bounds = array<i64: 8, 1>}, {pipeline_mode = #tpu.pipeline_mode<synchronous>, transform_indices = @transform_7, window_bounds = array<i64: 8, 1>}, {pipeline_mode = #tpu.pipeline_mode<synchronous>, transform_indices = @transform_8, window_bounds = array<i64: 8, 1>}, {pipeline_mode = #tpu.pipeline_mode<synchronous>, transform_indices = @transform_9, window_bounds = array<i64: 8, 8>}, {pipeline_mode = #tpu.pipeline_mode<synchronous>, transform_indices = @transform_10, window_bounds = array<i64: 8, 8>}, {pipeline_mode = #tpu.pipeline_mode<synchronous>, transform_indices = @transform_11, window_bounds = array<i64: 8, 1>}, {pipeline_mode = #tpu.pipeline_mode<synchronous>, transform_indices = @transform_12, window_bounds = array<i64: 8, 1>}, {transform_indices = @transform_13, window_bounds = array<i64: 8, 106>}, {transform_indices = @transform_14, window_bounds = array<i64: 8, 106>}, {transform_indices = @transform_15, window_bounds = array<i64: 8, 106>}, {transform_indices = @transform_16, window_bounds = array<i64: 1, 16, 106>}]} {
    %c0 = arith.constant 0 : index
    %c0_0 = arith.constant 0 : index
    %c0_1 = arith.constant 0 : index
    %0 = vector.load %arg2[%c0, %c0_0, %c0_1] : memref<1x16x106xf32, #tpu.memory_space<vmem>>, vector<1x8x106xf32>
    %1 = vector.shape_cast %0 : vector<1x8x106xf32> to vector<8x106xf32>
    %c0_2 = arith.constant 0 : index
    %c8 = arith.constant 8 : index
    %c0_3 = arith.constant 0 : index
    %2 = vector.load %arg2[%c0_2, %c8, %c0_3] : memref<1x16x106xf32, #tpu.memory_space<vmem>>, vector<1x8x106xf32>
    %3 = vector.shape_cast %2 : vector<1x8x106xf32> to vector<8x106xf32>
    %cst = arith.constant dense<0.000000e+00> : vector<106xf32>
    %4 = vector.multi_reduction <add>, %1, %cst [0] : vector<8x106xf32> to vector<106xf32>
    %5 = vector.shape_cast %4 : vector<106xf32> to vector<1x106xf32>
    %cst_4 = arith.constant 1.250000e-01 : f32
    %6 = vector.broadcast %cst_4 : f32 to vector<1x106xf32>
    %7 = arith.mulf %5, %6 : vector<1x106xf32>
    %cst_5 = arith.constant dense<0.000000e+00> : vector<106xf32>
    %8 = vector.multi_reduction <add>, %3, %cst_5 [0] : vector<8x106xf32> to vector<106xf32>
    %9 = vector.shape_cast %8 : vector<106xf32> to vector<1x106xf32>
    %cst_6 = arith.constant 1.250000e-01 : f32
    %10 = vector.broadcast %cst_6 : f32 to vector<1x106xf32>
    %11 = arith.mulf %9, %10 : vector<1x106xf32>
    %12 = vector.broadcast %7 : vector<1x106xf32> to vector<8x106xf32>
    %13 = arith.subf %1, %12 : vector<8x106xf32>
    %14 = vector.broadcast %11 : vector<1x106xf32> to vector<8x106xf32>
    %15 = arith.subf %3, %14 : vector<8x106xf32>
    %16 = arith.mulf %13, %13 : vector<8x106xf32>
    %cst_7 = arith.constant dense<0.000000e+00> : vector<106xf32>
    %17 = vector.multi_reduction <add>, %16, %cst_7 [0] : vector<8x106xf32> to vector<106xf32>
    %18 = vector.shape_cast %17 : vector<106xf32> to vector<1x106xf32>
    %19 = arith.mulf %15, %15 : vector<8x106xf32>
    %cst_8 = arith.constant dense<0.000000e+00> : vector<106xf32>
    %20 = vector.multi_reduction <add>, %19, %cst_8 [0] : vector<8x106xf32> to vector<106xf32>
    %21 = vector.shape_cast %20 : vector<106xf32> to vector<1x106xf32>
    %22 = arith.addf %18, %21 : vector<1x106xf32>
    %cst_9 = arith.constant 0.142857149 : f32
    %23 = vector.broadcast %cst_9 : f32 to vector<1x106xf32>
    %24 = arith.mulf %22, %23 : vector<1x106xf32>
    %25 = math.sqrt %24 : vector<1x106xf32>
    %cst_10 = arith.constant 1.060000e+02 : f32
    %26 = vector.broadcast %cst_10 : f32 to vector<1x106xf32>
    %27 = arith.addf %26, %25 : vector<1x106xf32>
    %28 = tpu.reciprocal %27 {approx = true} : vector<1x106xf32> -> vector<1x106xf32>
    %29 = vector.broadcast %28 : vector<1x106xf32> to vector<8x106xf32>
    %30 = arith.mulf %13, %29 : vector<8x106xf32>
    %c0_11 = arith.constant 0 : index
    %c0_12 = arith.constant 0 : index
    %31 = vector.load %arg3[%c0_11, %c0_12] : memref<8x1xf32, #tpu.memory_space<vmem>>, vector<8x1xf32>
    %32 = vector.broadcast %31 : vector<8x1xf32> to vector<8x106xf32>
    %33 = arith.mulf %30, %32 : vector<8x106xf32>
    %c0_13 = arith.constant 0 : index
    %c0_14 = arith.constant 0 : index
    %34 = vector.load %arg4[%c0_13, %c0_14] : memref<8x1xf32, #tpu.memory_space<vmem>>, vector<8x1xf32>
    %35 = vector.broadcast %34 : vector<8x1xf32> to vector<8x106xf32>
    %36 = arith.addf %33, %35 : vector<8x106xf32>
    %37 = arith.truncf %36 : vector<8x106xf32> to vector<8x106xbf16>
    %38 = vector.broadcast %28 : vector<1x106xf32> to vector<8x106xf32>
    %39 = arith.mulf %15, %38 : vector<8x106xf32>
    %c0_15 = arith.constant 0 : index
    %c0_16 = arith.constant 0 : index
    %40 = vector.load %arg3[%c0_15, %c0_16] : memref<8x1xf32, #tpu.memory_space<vmem>>, vector<8x1xf32>
    %41 = vector.broadcast %40 : vector<8x1xf32> to vector<8x106xf32>
    %42 = arith.mulf %39, %41 : vector<8x106xf32>
    %c0_17 = arith.constant 0 : index
    %c0_18 = arith.constant 0 : index
    %43 = vector.load %arg5[%c0_17, %c0_18] : memref<8x1xf32, #tpu.memory_space<vmem>>, vector<8x1xf32>
    %44 = vector.broadcast %43 : vector<8x1xf32> to vector<8x106xf32>
    %45 = arith.addf %42, %44 : vector<8x106xf32>
    %46 = arith.truncf %45 : vector<8x106xf32> to vector<8x106xbf16>
    %c0_19 = arith.constant 0 : index
    %c0_20 = arith.constant 0 : index
    %47 = vector.load %arg6[%c0_19, %c0_20] : memref<8x8xbf16, #tpu.memory_space<vmem>>, vector<8x8xbf16>
    %c0_21 = arith.constant 0 : index
    %c0_22 = arith.constant 0 : index
    %48 = vector.load %arg7[%c0_21, %c0_22] : memref<8x8xbf16, #tpu.memory_space<vmem>>, vector<8x8xbf16>
    %cst_23 = arith.constant dense<0.000000e+00> : vector<8x106xf32>
    %49 = tpu.matmul %47, %37, %cst_23 {dimension_numbers = #tpu.dot_dimension_numbers<[1], [0], [0], [1], [0, 0, 1, 1], [], []>} : vector<8x8xbf16>, vector<8x106xbf16>, vector<8x106xf32> -> vector<8x106xf32>
    %cst_24 = arith.constant dense<0.000000e+00> : vector<8x106xf32>
    %50 = tpu.matmul %48, %46, %cst_24 {dimension_numbers = #tpu.dot_dimension_numbers<[1], [0], [0], [1], [0, 0, 1, 1], [], []>} : vector<8x8xbf16>, vector<8x106xbf16>, vector<8x106xf32> -> vector<8x106xf32>
    %51 = arith.subf %49, %50 : vector<8x106xf32>
    %c0_25 = arith.constant 0 : index
    %c0_26 = arith.constant 0 : index
    %52 = vector.load %arg8[%c0_25, %c0_26] : memref<8x1xf32, #tpu.memory_space<vmem>>, vector<8x1xf32>
    %53 = vector.broadcast %52 : vector<8x1xf32> to vector<8x106xf32>
    %54 = arith.addf %51, %53 : vector<8x106xf32>
    %cst_27 = arith.constant dense<0.000000e+00> : vector<8x106xf32>
    %55 = tpu.matmul %48, %37, %cst_27 {dimension_numbers = #tpu.dot_dimension_numbers<[1], [0], [0], [1], [0, 0, 1, 1], [], []>} : vector<8x8xbf16>, vector<8x106xbf16>, vector<8x106xf32> -> vector<8x106xf32>
    %cst_28 = arith.constant dense<0.000000e+00> : vector<8x106xf32>
    %56 = tpu.matmul %47, %46, %cst_28 {dimension_numbers = #tpu.dot_dimension_numbers<[1], [0], [0], [1], [0, 0, 1, 1], [], []>} : vector<8x8xbf16>, vector<8x106xbf16>, vector<8x106xf32> -> vector<8x106xf32>
    %57 = arith.addf %55, %56 : vector<8x106xf32>
    %c0_29 = arith.constant 0 : index
    %c0_30 = arith.constant 0 : index
    %58 = vector.load %arg9[%c0_29, %c0_30] : memref<8x1xf32, #tpu.memory_space<vmem>>, vector<8x1xf32>
    %59 = vector.broadcast %58 : vector<8x1xf32> to vector<8x106xf32>
    %60 = arith.addf %57, %59 : vector<8x106xf32>
    %61 = arith.mulf %54, %54 : vector<8x106xf32>
    %62 = arith.mulf %60, %60 : vector<8x106xf32>
    %63 = arith.addf %61, %62 : vector<8x106xf32>
    %64 = math.sqrt %63 : vector<8x106xf32>
    %cst_31 = arith.constant 0.000000e+00 : f32
    %65 = vector.broadcast %cst_31 : f32 to vector<8x106xf32>
    %66 = arith.cmpf ogt, %64, %65 : vector<8x106xf32>
    %cst_32 = arith.constant 1.000000e+00 : f32
    %67 = vector.broadcast %cst_32 : f32 to vector<8x106xf32>
    %68 = arith.select %66, %64, %67 : vector<8x106xi1>, vector<8x106xf32>
    %c0_33 = arith.constant 0 : index
    %c0_34 = arith.constant 0 : index
    %69 = vector.load %arg10[%c0_33, %c0_34] : memref<8x1xf32, #tpu.memory_space<vmem>>, vector<8x1xf32>
    %70 = vector.broadcast %69 : vector<8x1xf32> to vector<8x106xf32>
    %71 = arith.addf %64, %70 : vector<8x106xf32>
    %cst_35 = arith.constant 0.000000e+00 : f32
    %72 = vector.broadcast %cst_35 : f32 to vector<8x106xf32>
    %73 = arith.maximumf %71, %72 : vector<8x106xf32>
    %74 = tpu.reciprocal %68 {approx = true} : vector<8x106xf32> -> vector<8x106xf32>
    %75 = arith.mulf %73, %74 : vector<8x106xf32>
    %cst_36 = arith.constant 1.000000e+00 : f32
    %76 = vector.broadcast %cst_36 : f32 to vector<8x106xf32>
    %77 = arith.select %66, %54, %76 : vector<8x106xi1>, vector<8x106xf32>
    %78 = arith.mulf %77, %75 : vector<8x106xf32>
    %79 = arith.truncf %78 : vector<8x106xf32> to vector<8x106xbf16>
    %80 = arith.mulf %60, %75 : vector<8x106xf32>
    %81 = arith.truncf %80 : vector<8x106xf32> to vector<8x106xbf16>
    %c0_37 = arith.constant 0 : index
    %c0_38 = arith.constant 0 : index
    %82 = vector.load %arg11[%c0_37, %c0_38] : memref<8x8xbf16, #tpu.memory_space<vmem>>, vector<8x8xbf16>
    %c0_39 = arith.constant 0 : index
    %c0_40 = arith.constant 0 : index
    %83 = vector.load %arg12[%c0_39, %c0_40] : memref<8x8xbf16, #tpu.memory_space<vmem>>, vector<8x8xbf16>
    %cst_41 = arith.constant dense<0.000000e+00> : vector<8x106xf32>
    %84 = tpu.matmul %82, %79, %cst_41 {dimension_numbers = #tpu.dot_dimension_numbers<[1], [0], [0], [1], [0, 0, 1, 1], [], []>} : vector<8x8xbf16>, vector<8x106xbf16>, vector<8x106xf32> -> vector<8x106xf32>
    %cst_42 = arith.constant dense<0.000000e+00> : vector<8x106xf32>
    %85 = tpu.matmul %83, %81, %cst_42 {dimension_numbers = #tpu.dot_dimension_numbers<[1], [0], [0], [1], [0, 0, 1, 1], [], []>} : vector<8x8xbf16>, vector<8x106xbf16>, vector<8x106xf32> -> vector<8x106xf32>
    %86 = arith.subf %84, %85 : vector<8x106xf32>
    %c0_43 = arith.constant 0 : index
    %c0_44 = arith.constant 0 : index
    %87 = vector.load %arg13[%c0_43, %c0_44] : memref<8x1xf32, #tpu.memory_space<vmem>>, vector<8x1xf32>
    %88 = vector.broadcast %87 : vector<8x1xf32> to vector<8x106xf32>
    %89 = arith.addf %86, %88 : vector<8x106xf32>
    %cst_45 = arith.constant dense<0.000000e+00> : vector<8x106xf32>
    %90 = tpu.matmul %83, %79, %cst_45 {dimension_numbers = #tpu.dot_dimension_numbers<[1], [0], [0], [1], [0, 0, 1, 1], [], []>} : vector<8x8xbf16>, vector<8x106xbf16>, vector<8x106xf32> -> vector<8x106xf32>
    %cst_46 = arith.constant dense<0.000000e+00> : vector<8x106xf32>
    %91 = tpu.matmul %82, %81, %cst_46 {dimension_numbers = #tpu.dot_dimension_numbers<[1], [0], [0], [1], [0, 0, 1, 1], [], []>} : vector<8x8xbf16>, vector<8x106xbf16>, vector<8x106xf32> -> vector<8x106xf32>
    %92 = arith.addf %90, %91 : vector<8x106xf32>
    %c0_47 = arith.constant 0 : index
    %c0_48 = arith.constant 0 : index
    %93 = vector.load %arg14[%c0_47, %c0_48] : memref<8x1xf32, #tpu.memory_space<vmem>>, vector<8x1xf32>
    %94 = vector.broadcast %93 : vector<8x1xf32> to vector<8x106xf32>
    %95 = arith.addf %92, %94 : vector<8x106xf32>
    %96 = arith.mulf %89, %89 : vector<8x106xf32>
    %97 = arith.mulf %95, %95 : vector<8x106xf32>
    %98 = arith.addf %96, %97 : vector<8x106xf32>
    %99 = math.sqrt %98 : vector<8x106xf32>
    %cst_49 = arith.constant 0.000000e+00 : f32
    %100 = vector.broadcast %cst_49 : f32 to vector<8x106xf32>
    %101 = arith.cmpf ogt, %99, %100 : vector<8x106xf32>
    %cst_50 = arith.constant 1.000000e+00 : f32
    %102 = vector.broadcast %cst_50 : f32 to vector<8x106xf32>
    %103 = arith.select %101, %99, %102 : vector<8x106xi1>, vector<8x106xf32>
    %c0_51 = arith.constant 0 : index
    %c0_52 = arith.constant 0 : index
    %104 = vector.load %arg15[%c0_51, %c0_52] : memref<8x106xbf16, #tpu.memory_space<vmem>>, vector<8x106xbf16>
    %105 = arith.extf %104 : vector<8x106xbf16> to vector<8x106xf32>
    %106 = arith.addf %99, %105 : vector<8x106xf32>
    %107 = arith.negf %106 : vector<8x106xf32>
    %108 = math.exp %107 : vector<8x106xf32>
    %cst_53 = arith.constant 1.000000e+00 : f32
    %109 = vector.broadcast %cst_53 : f32 to vector<8x106xf32>
    %110 = arith.addf %109, %108 : vector<8x106xf32>
    %111 = arith.divf %109, %110 : vector<8x106xf32>
    %112 = tpu.reciprocal %103 {approx = true} : vector<8x106xf32> -> vector<8x106xf32>
    %113 = arith.mulf %111, %112 : vector<8x106xf32>
    %cst_54 = arith.constant 1.000000e+00 : f32
    %114 = vector.broadcast %cst_54 : f32 to vector<8x106xf32>
    %115 = arith.select %101, %89, %114 : vector<8x106xi1>, vector<8x106xf32>
    %c0_55 = arith.constant 0 : index
    %c0_56 = arith.constant 0 : index
    %116 = vector.load %arg16[%c0_55, %c0_56] : memref<8x106xbf16, #tpu.memory_space<vmem>>, vector<8x106xbf16>
    %117 = arith.extf %116 : vector<8x106xbf16> to vector<8x106xf32>
    %c0_57 = arith.constant 0 : index
    %c0_58 = arith.constant 0 : index
    %118 = vector.load %arg17[%c0_57, %c0_58] : memref<8x106xbf16, #tpu.memory_space<vmem>>, vector<8x106xbf16>
    %119 = arith.extf %118 : vector<8x106xbf16> to vector<8x106xf32>
    %120 = arith.mulf %115, %117 : vector<8x106xf32>
    %121 = arith.mulf %95, %119 : vector<8x106xf32>
    %122 = arith.subf %120, %121 : vector<8x106xf32>
    %123 = arith.mulf %113, %122 : vector<8x106xf32>
    %124 = arith.mulf %95, %117 : vector<8x106xf32>
    %125 = arith.mulf %115, %119 : vector<8x106xf32>
    %126 = arith.addf %124, %125 : vector<8x106xf32>
    %127 = arith.mulf %113, %126 : vector<8x106xf32>
    %c0_59 = arith.constant 0 : index
    %c0_60 = arith.constant 0 : index
    %c0_61 = arith.constant 0 : index
    %128 = vector.load %arg2[%c0_59, %c0_60, %c0_61] : memref<1x16x106xf32, #tpu.memory_space<vmem>>, vector<1x8x106xf32>
    %129 = vector.shape_cast %128 : vector<1x8x106xf32> to vector<8x106xf32>
    %c0_62 = arith.constant 0 : index
    %c8_63 = arith.constant 8 : index
    %c0_64 = arith.constant 0 : index
    %130 = vector.load %arg2[%c0_62, %c8_63, %c0_64] : memref<1x16x106xf32, #tpu.memory_space<vmem>>, vector<1x8x106xf32>
    %131 = vector.shape_cast %130 : vector<1x8x106xf32> to vector<8x106xf32>
    %132 = arith.mulf %129, %123 : vector<8x106xf32>
    %133 = arith.mulf %131, %127 : vector<8x106xf32>
    %134 = arith.subf %132, %133 : vector<8x106xf32>
    %c0_65 = arith.constant 0 : index
    %c0_66 = arith.constant 0 : index
    %c0_67 = arith.constant 0 : index
    %135 = vector.load %arg18[%c0_65, %c0_66, %c0_67] : memref<1x16x106xf32, #tpu.memory_space<vmem>>, vector<1x8x106xf32>
    %136 = vector.shape_cast %135 : vector<1x8x106xf32> to vector<8x106xf32>
    %137 = vector.shape_cast %134 : vector<8x106xf32> to vector<1x8x106xf32>
    tpu.vector_store %arg18[%c0_65, %c0_66, %c0_67], %137 {strides = array<i32>} : memref<1x16x106xf32, #tpu.memory_space<vmem>>, vector<1x8x106xf32>,
    %138 = arith.mulf %129, %127 : vector<8x106xf32>
    %139 = arith.mulf %131, %123 : vector<8x106xf32>
    %140 = arith.addf %138, %139 : vector<8x106xf32>
    %c0_68 = arith.constant 0 : index
    %c8_69 = arith.constant 8 : index
    %c0_70 = arith.constant 0 : index
    %141 = vector.load %arg18[%c0_68, %c8_69, %c0_70] : memref<1x16x106xf32, #tpu.memory_space<vmem>>, vector<1x8x106xf32>
    %142 = vector.shape_cast %141 : vector<1x8x106xf32> to vector<8x106xf32>
    %143 = vector.shape_cast %140 : vector<8x106xf32> to vector<1x8x106xf32>
    tpu.vector_store %arg18[%c0_68, %c8_69, %c0_70], %143 {strides = array<i32>} : memref<1x16x106xf32, #tpu.memory_space<vmem>>, vector<1x8x106xf32>,
    return
  }
  func.func @transform_0(%arg0: i32, %arg1: i32) -> (i32, i32, i32) {
    %c0_i32 = arith.constant 0 : i32
    %c0_i32_0 = arith.constant 0 : i32
    return %arg1, %c0_i32, %arg0 : i32, i32, i32
  }
  func.func @transform_1(%arg0: i32, %arg1: i32) -> (i32, i32) {
    %c0_i32 = arith.constant 0 : i32
    %c0_i32_0 = arith.constant 0 : i32
    %c0_i32_1 = arith.constant 0 : i32
    return %c0_i32, %c0_i32_0 : i32, i32
  }
  func.func @transform_2(%arg0: i32, %arg1: i32) -> (i32, i32) {
    %c0_i32 = arith.constant 0 : i32
    %c0_i32_0 = arith.constant 0 : i32
    %c0_i32_1 = arith.constant 0 : i32
    return %c0_i32, %c0_i32_0 : i32, i32
  }
  func.func @transform_3(%arg0: i32, %arg1: i32) -> (i32, i32) {
    %c0_i32 = arith.constant 0 : i32
    %c0_i32_0 = arith.constant 0 : i32
    %c0_i32_1 = arith.constant 0 : i32
    return %c0_i32, %c0_i32_0 : i32, i32
  }
  func.func @transform_4(%arg0: i32, %arg1: i32) -> (i32, i32) {
    %c0_i32 = arith.constant 0 : i32
    %c0_i32_0 = arith.constant 0 : i32
    %c0_i32_1 = arith.constant 0 : i32
    return %c0_i32, %c0_i32_0 : i32, i32
  }
  func.func @transform_5(%arg0: i32, %arg1: i32) -> (i32, i32) {
    %c0_i32 = arith.constant 0 : i32
    %c0_i32_0 = arith.constant 0 : i32
    %c0_i32_1 = arith.constant 0 : i32
    return %c0_i32, %c0_i32_0 : i32, i32
  }
  func.func @transform_6(%arg0: i32, %arg1: i32) -> (i32, i32) {
    %c0_i32 = arith.constant 0 : i32
    %c0_i32_0 = arith.constant 0 : i32
    %c0_i32_1 = arith.constant 0 : i32
    return %c0_i32, %c0_i32_0 : i32, i32
  }
  func.func @transform_7(%arg0: i32, %arg1: i32) -> (i32, i32) {
    %c0_i32 = arith.constant 0 : i32
    %c0_i32_0 = arith.constant 0 : i32
    %c0_i32_1 = arith.constant 0 : i32
    return %c0_i32, %c0_i32_0 : i32, i32
  }
  func.func @transform_8(%arg0: i32, %arg1: i32) -> (i32, i32) {
    %c0_i32 = arith.constant 0 : i32
    %c0_i32_0 = arith.constant 0 : i32
    %c0_i32_1 = arith.constant 0 : i32
    return %c0_i32, %c0_i32_0 : i32, i32
  }
  func.func @transform_9(%arg0: i32, %arg1: i32) -> (i32, i32) {
    %c0_i32 = arith.constant 0 : i32
    %c0_i32_0 = arith.constant 0 : i32
    %c0_i32_1 = arith.constant 0 : i32
    return %c0_i32, %c0_i32_0 : i32, i32
  }
  func.func @transform_10(%arg0: i32, %arg1: i32) -> (i32, i32) {
    %c0_i32 = arith.constant 0 : i32
    %c0_i32_0 = arith.constant 0 : i32
    %c0_i32_1 = arith.constant 0 : i32
    return %c0_i32, %c0_i32_0 : i32, i32
  }
  func.func @transform_11(%arg0: i32, %arg1: i32) -> (i32, i32) {
    %c0_i32 = arith.constant 0 : i32
    %c0_i32_0 = arith.constant 0 : i32
    %c0_i32_1 = arith.constant 0 : i32
    return %c0_i32, %c0_i32_0 : i32, i32
  }
  func.func @transform_12(%arg0: i32, %arg1: i32) -> (i32, i32) {
    %c0_i32 = arith.constant 0 : i32
    %c0_i32_0 = arith.constant 0 : i32
    %c0_i32_1 = arith.constant 0 : i32
    return %c0_i32, %c0_i32_0 : i32, i32
  }
  func.func @transform_13(%arg0: i32, %arg1: i32) -> (i32, i32) {
    %c0_i32 = arith.constant 0 : i32
    %c0_i32_0 = arith.constant 0 : i32
    return %c0_i32, %arg0 : i32, i32
  }
  func.func @transform_14(%arg0: i32, %arg1: i32) -> (i32, i32) {
    %c0_i32 = arith.constant 0 : i32
    %c0_i32_0 = arith.constant 0 : i32
    return %c0_i32, %arg0 : i32, i32
  }
  func.func @transform_15(%arg0: i32, %arg1: i32) -> (i32, i32) {
    %c0_i32 = arith.constant 0 : i32
    %c0_i32_0 = arith.constant 0 : i32
    return %c0_i32, %arg0 : i32, i32
  }
  func.func @transform_16(%arg0: i32, %arg1: i32) -> (i32, i32, i32) {
    %c0_i32 = arith.constant 0 : i32
    %c0_i32_0 = arith.constant 0 : i32
    return %arg1, %c0_i32, %arg0 : i32, i32, i32
  }
}

module attributes {stable_mosaic.version = 11 : i64} {
  func.func @_linear_kernel(%arg0: i32, %arg1: memref<32x128xf32, #tpu.memory_space<vmem>>, %arg2: memref<128x128xbf16, #tpu.memory_space<vmem>>, %arg3: memref<1x128xf32, #tpu.memory_space<vmem>>, %arg4: memref<32x128xf32, #tpu.memory_space<vmem>>) attributes {dimension_semantics = [#tpu.dimension_semantics<parallel>], iteration_bounds = array<i64: 1>, scalar_prefetch = 0 : i64, scratch_operands = 0 : i64, tpu.core_type = #tpu.core_type<tc>, window_params = [{transform_indices = @transform_0, window_bounds = array<i64: 32, 128>}, {pipeline_mode = #tpu.pipeline_mode<synchronous>, transform_indices = @transform_1, window_bounds = array<i64: 128, 128>}, {pipeline_mode = #tpu.pipeline_mode<synchronous>, transform_indices = @transform_2, window_bounds = array<i64: 1, 128>}, {transform_indices = @transform_3, window_bounds = array<i64: 32, 128>}]} {
    %c0 = arith.constant 0 : index
    %c0_0 = arith.constant 0 : index
    %0 = vector.load %arg1[%c0, %c0_0] : memref<32x128xf32, #tpu.memory_space<vmem>>, vector<32x128xf32>
    %1 = arith.truncf %0 : vector<32x128xf32> to vector<32x128xbf16>
    %c0_1 = arith.constant 0 : index
    %c0_2 = arith.constant 0 : index
    %2 = vector.load %arg2[%c0_1, %c0_2] : memref<128x128xbf16, #tpu.memory_space<vmem>>, vector<128x128xbf16>
    %cst = arith.constant dense<0.000000e+00> : vector<32x128xf32>
    %3 = tpu.matmul %1, %2, %cst {dimension_numbers = #tpu.dot_dimension_numbers<[1], [0], [0], [1], [0, 0, 1, 1], [], []>} : vector<32x128xbf16>, vector<128x128xbf16>, vector<32x128xf32> -> vector<32x128xf32>
    %c0_3 = arith.constant 0 : index
    %c0_4 = arith.constant 0 : index
    %4 = vector.load %arg3[%c0_3, %c0_4] : memref<1x128xf32, #tpu.memory_space<vmem>>, vector<1x128xf32>
    %5 = vector.broadcast %4 : vector<1x128xf32> to vector<32x128xf32>
    %6 = arith.addf %3, %5 : vector<32x128xf32>
    %c0_5 = arith.constant 0 : index
    %c0_6 = arith.constant 0 : index
    %7 = vector.load %arg4[%c0_5, %c0_6] : memref<32x128xf32, #tpu.memory_space<vmem>>, vector<32x128xf32>
    tpu.vector_store %arg4[%c0_5, %c0_6], %6 {strides = array<i32>} : memref<32x128xf32, #tpu.memory_space<vmem>>, vector<32x128xf32>,
    return
  }
  func.func @transform_0(%arg0: i32) -> (i32, i32) {
    %c0_i32 = arith.constant 0 : i32
    %c0_i32_0 = arith.constant 0 : i32
    return %arg0, %c0_i32 : i32, i32
  }
  func.func @transform_1(%arg0: i32) -> (i32, i32) {
    %c0_i32 = arith.constant 0 : i32
    %c0_i32_0 = arith.constant 0 : i32
    %c0_i32_1 = arith.constant 0 : i32
    return %c0_i32, %c0_i32_0 : i32, i32
  }
  func.func @transform_2(%arg0: i32) -> (i32, i32) {
    %c0_i32 = arith.constant 0 : i32
    %c0_i32_0 = arith.constant 0 : i32
    %c0_i32_1 = arith.constant 0 : i32
    return %c0_i32, %c0_i32_0 : i32, i32
  }
  func.func @transform_3(%arg0: i32) -> (i32, i32) {
    %c0_i32 = arith.constant 0 : i32
    %c0_i32_0 = arith.constant 0 : i32
    return %arg0, %c0_i32 : i32, i32
  }
}

</mosaic_0001>

<bundles_post_ra>
// kernel: refno_block.3
= control target key start
LH: loop header
LB: loop body
LE: loop exit
PB: predicated region body
PF: predicated region fallthrough
CT: control target
= control target key end

     0   :  { %s460_s1 = inlined_call_operand.vmem [shape: bf16[128,128], index: 1, kind: input, shape index: {}]   ;;  %s461_s2 = inlined_call_operand.vmem [shape: f32[1,128], index: 2, kind: input, shape index: {}]   ;;  %s462_s0 = inlined_call_operand.vmem [shape: f32[32,128], index: 0, kind: input, shape index: {}]   ;;  %s463_s4 = inlined_call_operand.vmem [shape: f32[1,128], index: 4, kind: input, shape index: {}]   ;;  %s464_s3 = inlined_call_operand.vmem [shape: bf16[128,128], index: 3, kind: input, shape index: {}]   ;;  %s465_s5 = inlined_call_operand.vmem [shape: f32[32,128], index: 5, kind: output, shape index: {}]  }
   0x1   :  { %v317_v0 = vld [vmem:[%s460_s1 + $0x38] sm:$0xff]  ;;  %v316_v1 = vld [vmem:[%s460_s1 + $0x30] sm:$0xff]  ;;  %v315_v2 = vld [vmem:[%s460_s1 + $0x28] sm:$0xff] }
   0x2   :  { %94 = vmatpush.bf16.msra.mxu0 %v317_v0  ;;  %326 = vmatpush.bf16.msra.mxu2 %v317_v0  ;;  %v314_v3 = vld [vmem:[%s460_s1 + $0x20] sm:$0xff]  ;;  %v313_v4 = vld [vmem:[%s460_s1 + $0x18] sm:$0xff]  ;;  %v312_v5 = vld [vmem:[%s460_s1 + $0x10] sm:$0xff] }
   0x3   :  { %v311_v6 = vld [vmem:[%s460_s1 + $0x8] sm:$0xff]  ;;  %v310_v7 = vld [vmem:[%s460_s1] sm:$0xff]  ;;  %v22_v10 = vld [vmem:[%s462_s0 + $0x10] sm:$0xff] }
   0x4   :  { %v20_v8 = vld [vmem:[%s462_s0] sm:$0xff]  ;;  %v21_v9 = vld [vmem:[%s462_s0 + $0x8] sm:$0xff]  ;;  %v23_v11 = vld [vmem:[%s462_s0 + $0x18] sm:$0xff] }
   0x5   :  { %v24_v12 = vpack.c.bf16 %v21_v9, %v20_v8  ;;  %v25_v13 = vpack.c.bf16 %v23_v11, %v22_v10  ;;  %v325_v14 = vld [vmem:[%s464_s3 + $0x38] sm:$0xff]  ;;  %v324_v15 = vld [vmem:[%s464_s3 + $0x30] sm:$0xff]  ;;  %v323_v16 = vld [vmem:[%s464_s3 + $0x28] sm:$0xff] }
   0x6   :  { %95 = vmatpush.bf16.msra.mxu0 %v316_v1  ;;  %327 = vmatpush.bf16.msra.mxu2 %v316_v1  ;;  %v322_v17 = vld [vmem:[%s464_s3 + $0x20] sm:$0xff]  ;;  %v321_v18 = vld [vmem:[%s464_s3 + $0x18] sm:$0xff]  ;;  %v320_v19 = vld [vmem:[%s464_s3 + $0x10] sm:$0xff] }
   0x7   :  { %219 = vmatpush.bf16.msra.mxu1 %v325_v14  ;;  %334 = vmatpush.bf16.msra.mxu3 %v325_v14  ;;  %v319_v20 = vld [vmem:[%s464_s3 + $0x8] sm:$0xff]  ;;  %v342_v21 = vld [vmem:[%s461_s2] ss:$0 sm:$0xff] }
   0x8   :  { %v318_v22 = vld [vmem:[%s464_s3] sm:$0xff] }
   0xa   :  { %96 = vmatpush.bf16.msra.mxu0 %v315_v2  ;;  %328 = vmatpush.bf16.msra.mxu2 %v315_v2 }
   0xb   :  { %220 = vmatpush.bf16.msra.mxu1 %v324_v15  ;;  %335 = vmatpush.bf16.msra.mxu3 %v324_v15 }
   0xe   :  { %97 = vmatpush.bf16.msra.mxu0 %v314_v3  ;;  %329 = vmatpush.bf16.msra.mxu2 %v314_v3 }
   0xf   :  { %221 = vmatpush.bf16.msra.mxu1 %v323_v16  ;;  %336 = vmatpush.bf16.msra.mxu3 %v323_v16 }
  0x12   :  { %98 = vmatpush.bf16.msra.mxu0 %v313_v4  ;;  %330 = vmatpush.bf16.msra.mxu2 %v313_v4 }
  0x13   :  { %222 = vmatpush.bf16.msra.mxu1 %v322_v17  ;;  %337 = vmatpush.bf16.msra.mxu3 %v322_v17 }
  0x16   :  { %99 = vmatpush.bf16.msra.mxu0 %v312_v5  ;;  %331 = vmatpush.bf16.msra.mxu2 %v312_v5  ;;  %v343_v5 = vld [vmem:[%s463_s4] ss:$0 sm:$0xff] }
  0x17   :  { %223 = vmatpush.bf16.msra.mxu1 %v321_v18  ;;  %338 = vmatpush.bf16.msra.mxu3 %v321_v18 }
  0x1a   :  { %100 = vmatpush.bf16.msra.mxu0 %v311_v6  ;;  %332 = vmatpush.bf16.msra.mxu2 %v311_v6 }
  0x1b   :  { %224 = vmatpush.bf16.msra.mxu1 %v320_v19  ;;  %339 = vmatpush.bf16.msra.mxu3 %v320_v19 }
  0x1e   :  { %101 = vmatpush.bf16.msra.mxu0 %v310_v7  ;;  %333 = vmatpush.bf16.msra.mxu2 %v310_v7 }
  0x1f   :  { %225 = vmatpush.bf16.msra.mxu1 %v319_v20  ;;  %340 = vmatpush.bf16.msra.mxu3 %v319_v20 }
  0x21   :  { %102 = vmatmul.bf16.vlgmr.msra.gmra.mxu0 %v24_v12  ;;  %107 = vmatmul.bf16.vlgmr.msra.gmra.mxu2 %v25_v13 }
  0x23   :  { %226 = vmatpush.bf16.msra.mxu1 %v318_v22  ;;  %341 = vmatpush.bf16.msra.mxu3 %v318_v22 }
  0x9e   :  { %v103_v23 = vpop.f32.mrf.mxu0 }
  0x9f   :  { %v104_v24 = vadd.f32 %v342_v21, %v103_v23 }
  0xa1   :  { %v113_v25 = vmul.f32 %v104_v24, %v104_v24 }
  0xa3   :  { %v117_v26 = vmul.f32 %v113_v25, %v104_v24 }
  0xa4   :  { %v108_v27 = vpop.f32.mrf.mxu2 }
  0xa5   :  { %v121_v28 = vmul.f32 0.044715, %v117_v26  ;;  %v109_v29 = vadd.f32 %v342_v21, %v108_v27 }
  0xa6   :  { %v105_v30 = vpop.f32.mrf.mxu0 }
  0xa7   :  { %v125_v31 = vadd.f32 %v121_v28, %v104_v24  ;;  %v115_v32 = vmul.f32 %v109_v29, %v109_v29  ;;  %v106_v33 = vadd.f32 %v342_v21, %v105_v30 }
  0xa9   :  { %v119_v34 = vmul.f32 %v115_v32, %v109_v29  ;;  %v114_v35 = vmul.f32 %v106_v33, %v106_v33  ;;  %v129_v36 = vmul.f32 0.7978846, %v125_v31 }
  0xab   :  { %v123_v37 = vmul.f32 0.044715, %v119_v34  ;;  %v118_v38 = vmul.f32 %v114_v35, %v106_v33  ;;  %344 = vtanh.f32 %v129_v36 }
  0xac   :  { %v110_v39 = vpop.f32.mrf.mxu2 }
  0xad   :  { %v127_v40 = vadd.f32 %v123_v37, %v109_v29  ;;  %v122_v41 = vmul.f32 0.044715, %v118_v38  ;;  %v111_v42 = vadd.f32 %v342_v21, %v110_v39 }
  0xaf   :  { %v126_v43 = vadd.f32 %v122_v41, %v106_v33  ;;  %v116_v44 = vmul.f32 %v111_v42, %v111_v42  ;;  %v131_v45 = vmul.f32 0.7978846, %v127_v40 }
  0xb1   :  { %v120_v46 = vmul.f32 %v116_v44, %v111_v42  ;;  %v130_v47 = vmul.f32 0.7978846, %v126_v43  ;;  %346 = vtanh.f32 %v131_v45  ;;  %v345_v48 = vpop.eup %344 }
  0xb2   :  { %v137_v51 = vadd.f32 1.0, %v345_v48 }
  0xb3   :  { %v124_v49 = vmul.f32 0.044715, %v120_v46  ;;  %348 = vtanh.f32 %v130_v47 }
  0xb4   :  { %v141_v56 = vmul.f32 0.5, %v137_v51 }
  0xb5   :  { %v128_v50 = vadd.f32 %v124_v49, %v111_v42 }
  0xb6   :  { %v145_v59 = vmul.f32 %v141_v56, %v104_v24 }
  0xb7   :  { %v132_v52 = vmul.f32 0.7978846, %v128_v50  ;;  %v347_v53 = vpop.eup %346 }
  0xb8   :  { %v139_v58 = vadd.f32 1.0, %v347_v53 }
  0xb9   :  { %v349_v54 = vpop.eup %348  ;;  %350 = vtanh.f32 %v132_v52 }
  0xba   :  { %v138_v55 = vadd.f32 1.0, %v349_v54  ;;  %v143_v0 = vmul.f32 0.5, %v139_v58 }
  0xbc   :  { %v142_v57 = vmul.f32 0.5, %v138_v55  ;;  %v147_v2 = vmul.f32 %v143_v0, %v109_v29 }
  0xbe   :  { %v146_v60 = vmul.f32 %v142_v57, %v106_v33 }
  0xbf   :  { %v351_v61 = vpop.eup %350 }
  0xc0   :  { %v149_v62 = vpack.c.bf16 %v146_v60, %v145_v59  ;;  %v140_v63 = vadd.f32 1.0, %v351_v61 }
  0xc2   :  { %227 = vmatmul.bf16.vlgmr.msra.gmra.mxu1 %v149_v62  ;;  %v144_v1 = vmul.f32 0.5, %v140_v63 }
  0xc4   :  { %v148_v3 = vmul.f32 %v144_v1, %v111_v42 }
  0xc6   :  { %v150_v4 = vpack.c.bf16 %v148_v3, %v147_v2 }
  0xc8   :  { %232 = vmatmul.bf16.vlgmr.msra.gmra.mxu3 %v150_v4 }
 0x13f   :  { %v228_v6 = vpop.f32.mrf.mxu1 }
 0x140   :  { %v229_v7 = vadd.f32 %v343_v5, %v228_v6 }
 0x142   :  { %238 = vst [vmem:[%s465_s5] sm:$0xff] %v229_v7 }
 0x147   :  { %v230_v8 = vpop.f32.mrf.mxu1 }
 0x148   :  { %v231_v9 = vadd.f32 %v343_v5, %v230_v8 }
 0x14a   :  { %239 = vst [vmem:[%s465_s5 + $0x8] sm:$0xff] %v231_v9 }
 0x14b   :  { %v233_v10 = vpop.f32.mrf.mxu3 }
 0x14c   :  { %v234_v11 = vadd.f32 %v343_v5, %v233_v10 }
 0x14e   :  { %240 = vst [vmem:[%s465_s5 + $0x10] sm:$0xff] %v234_v11 }
 0x153   :  { %v235_v12 = vpop.f32.mrf.mxu3 }
 0x154   :  { %v236_v13 = vadd.f32 %v343_v5, %v235_v12 }
 0x156   :  { %241 = vst [vmem:[%s465_s5 + $0x18] sm:$0xff] %v236_v13 }

// kernel: refno_block.4
= control target key start
LH: loop header
LB: loop body
LE: loop exit
PB: predicated region body
PF: predicated region fallthrough
CT: control target
= control target key end

     0   :  { %s1250_s21 = smov 0   ;;  %s1252_s22 = smov 0   ;;  %s1365_s0 = inlined_call_operand.vmem [shape: f32[2,16,106], index: 0, kind: input, shape index: {}]   ;;  %s1366_s1 = inlined_call_operand.vmem [shape: f32[8,1], index: 1, kind: input, shape index: {}]   ;;  %s1367_s2 = inlined_call_operand.vmem [shape: f32[8,1], index: 2, kind: input, shape index: {}, may-alias: {2,3}]   ;;  %s1368_s3 = inlined_call_operand.vmem [shape: f32[8,1], index: 3, kind: input, shape index: {}, may-alias: {2,3}]   ;;  %s1369_s4 = inlined_call_operand.vmem [shape: bf16[8,8], index: 4, kind: input, shape index: {}]   ;;  %s1370_s5 = inlined_call_operand.vmem [shape: bf16[8,8], index: 5, kind: input, shape index: {}]   ;;  %s1371_s6 = inlined_call_operand.vmem [shape: f32[8,1], index: 6, kind: input, shape index: {}]   ;;  %s1372_s7 = inlined_call_operand.vmem [shape: f32[8,1], index: 7, kind: input, shape index: {}]   ;;  %s1373_s8 = inlined_call_operand.vmem [shape: f32[8,1], index: 8, kind: input, shape index: {}]   ;;  %s1374_s9 = inlined_call_operand.vmem [shape: bf16[8,8], index: 9, kind: input, shape index: {}]   ;;  %s1375_s10 = inlined_call_operand.vmem [shape: bf16[8,8], index: 10, kind: input, shape index: {}]   ;;  %s1376_s11 = inlined_call_operand.vmem [shape: f32[8,1], index: 11, kind: input, shape index: {}]   ;;  %s1377_s12 = inlined_call_operand.vmem [shape: f32[8,1], index: 12, kind: input, shape index: {}]   ;;  %s1378_s13 = inlined_call_operand.vmem [shape: bf16[8,106], index: 13, kind: input, shape index: {}]   ;;  %s1379_s14 = inlined_call_operand.vmem [shape: bf16[8,106], index: 14, kind: input, shape index: {}]   ;;  %s1380_s15 = inlined_call_operand.vmem [shape: bf16[8,106], index: 15, kind: input, shape index: {}]   ;;  %s1381_s16 = inlined_call_operand.vmem [shape: f32[2,16,106], index: 16, kind: output, shape index: {}]  }
   0x1   :  { %1382 = sst [smem:[#allocation2_spill]] %s1365_s0  ;;  %s1254_s23 = smov 0  }
   0x2 LB: > { %s35_s24 = sadd.s32 1, %s1158_s22  ;;  %p1078_p0 = scmp.ge.s32.totalorder %s1162_s23, 1  ;;  %s1162_s23 = sphi %s1254_s23, %s26_s23   ;;  %s1158_s22 = sphi %s1252_s22, %s1385_s22   ;;  %s1154_s21 = sphi %s1250_s21, %s1384_s21  }
   0x3   : > { %p36_p1 = scmp.ge.s32.totalorder %s35_s24, 2  ;;  %p508_p2 = scmp.lt.s32.totalorder %s1162_s23, 3 }
   0x5   : > { %s1387_s24 = smov (%p36_p1, %s35_s24), 0  ;;  %p509_p3 = pnand %p1078_p0, %p508_p2 }
   0x6   : > { %p576_p4 = scmp.lt.s32.totalorder (!%p509_p3), %s1154_s21, 1  ;;  %s1383_s25 = sld [smem:[#allocation2_spill]] (!%p509_p3) }
   0x7   : > { %512 = sbr.rel (%p509_p3) target bundleno = 527 (0x20f), region = 84 }
   0xc   : > { %v676_v0 = vld [vmem:[%s1368_s3] sm:$0xff]  ;;  %v1164_v2 = vmov 0   ;;  %s1389_s21 = smov (!%p576_p4, %s1154_s21), 1  ;;  %vm607_vm0 = vcmask 867328   ;;  %vm690_vm3 = vcmask 1043456   ;;  %vm686_vm4 = vcmask 64512  }
   0xd   : > { %v659_v1 = vld [vmem:[%s1366_s1] sm:$0xff]  ;;  %1122 = vset.pattern.permute.xlu1 %v1164_v2  ;;  %1121 = vset.pattern.permute.xlu0 %v1164_v2  ;;  %s1094_s18 = sshll.u32 %s1389_s21, 4 }
   0xe   : > { %679 = vperm.xlu1 %1122, %v676_v0   ;;  %662 = vperm.xlu0 %1121, %v659_v1   ;;  %v727_v3 = vld [vmem:[%s1371_s6] sm:$0xff]  ;;  %s583_s26 = scalar_lea.vmem %s1383_s25, %s1094_s18  ;;  %s603_s0 = scalar_lea.vmem %s1381_s16, %s1094_s18 }
   0xf   : > { %1123 = vset.pattern.permute.xlu2 %v1164_v2  ;;  %v666_v4 = vld [vmem:[%s1367_s2] sm:$0xff]  ;;  %v1296_v8 = vld [vmem:[%s583_s26 + $0x8] sm:$0xff] }
  0x10   : > { %v873_v5 = vld [vmem:[%s1377_s12] sm:$0xff]  ;;  %v616_v10 = vsel %vm607_vm0, %v1296_v8, 0.0 }
  0x11   : > { %v840_v6 = vld [vmem:[%s1376_s11] sm:$0xff]  ;;  %v617_v12 = vrot.slane %v616_v10, 4 }
  0x12   : > { %v1294_v7 = vld [vmem:[%s583_s26] sm:$0xff] }
  0x13   : > { %v608_v9 = vsel %vm607_vm0, %v1294_v7, 0.0  ;;  %v618_v14 = vadd.f32 %v617_v12, %v616_v10  ;;  %v760_v56 = vld [vmem:[%s1372_s7] sm:$0xff] }
  0x14   : > { %v609_v11 = vrot.slane %v608_v9, 4  ;;  %763 = vperm.xlu2 %1123, %v760_v56   ;;  %v784_v57 = vld [vmem:[%s1373_s8] sm:$0xff] }
  0x15   : > { %v619_v16 = vrot.slane %v618_v14, 2 }
  0x16   : > { %730 = vperm.xlu1 %1122, %v727_v3   ;;  %669 = vperm.xlu0 %1121, %v666_v4   ;;  %v610_v13 = vadd.f32 %v609_v11, %v608_v9 }
  0x17   : > { %v620_v18 = vadd.f32 %v619_v16, %v618_v14 }
  0x18   : > { %v611_v15 = vrot.slane %v610_v13, 2 }
  0x19   : > { %v621_v20 = vrot.slane %v620_v18, 1 }
  0x1a   : > { %v612_v17 = vadd.f32 %v611_v15, %v610_v13 }
  0x1b   : > { %v622_v22 = vadd.f32 %v621_v20, %v620_v18 }
  0x1c   : > { %v613_v19 = vrot.slane %v612_v17, 1  ;;  %787 = vperm.xlu2 %1123, %v784_v57  }
  0x1d   : > { %v623_v24 = vmul.f32 0.125, %v622_v22 }
  0x1e   : > { %876 = vperm.xlu1 %1122, %v873_v5   ;;  %843 = vperm.xlu0 %1121, %v840_v6   ;;  %v614_v21 = vadd.f32 %v613_v19, %v612_v17  ;;  %v684_v5 = vld [vmem:[%s1369_s4] sm:$0xf] }
  0x1f   : > { %v625_v26 = vsub.f32 %v1296_v8, %v623_v24  ;;  %v685_v6 = vld [vmem:[%s1370_s5] sm:$0xf] }
  0x20   : > { %v615_v23 = vmul.f32 0.125, %v614_v21 }
  0x21   : > { %v634_v28 = vmul.f32 %v625_v26, %v625_v26 }
  0x22   : > { %v624_v25 = vsub.f32 %v1294_v7, %v615_v23 }
  0x23   : > { %v635_v30 = vsel %vm607_vm0, %v634_v28, 0.0 }
  0x24   : > { %v626_v27 = vmul.f32 %v624_v25, %v624_v25  ;;  %v636_v32 = vrot.slane %v635_v30, 4 }
  0x26   : > { %v627_v29 = vsel %vm607_vm0, %v626_v27, 0.0  ;;  %v637_v34 = vadd.f32 %v636_v32, %v635_v30 }
  0x27   : > { %v628_v31 = vrot.slane %v627_v29, 4 }
  0x28   : > { %v638_v36 = vrot.slane %v637_v34, 2 }
  0x29   : > { %v629_v33 = vadd.f32 %v628_v31, %v627_v29 }
  0x2a   : > { %v639_v38 = vadd.f32 %v638_v36, %v637_v34 }
  0x2b   : > { %v630_v35 = vrot.slane %v629_v33, 2 }
  0x2c   : > { %v640_v40 = vrot.slane %v639_v38, 1 }
  0x2d   : > { %v631_v37 = vadd.f32 %v630_v35, %v629_v33 }
  0x2e   : > { %v641_v42 = vadd.f32 %v640_v40, %v639_v38 }
  0x2f   : > { %v632_v39 = vrot.slane %v631_v37, 1 }
  0x31   : > { %v633_v41 = vadd.f32 %v632_v39, %v631_v37 }
  0x33   : > { %v642_v43 = vadd.f32 %v641_v42, %v633_v41 }
  0x35   : > { %v643_v44 = vmul.f32 0.14285715, %v642_v43 }
  0x37   : > { %1124 = vrsqrt.f32 %v643_v44  ;;  %vm651_vm1 = vcmp.eq.f32.partialorder %v643_v44, inf  ;;  %v654_v52 = vand.u32 2147483648, %v643_v44  ;;  %vm653_vm2 = vcmp.eq.f32.partialorder %v643_v44, 0.0 }
  0x3d   : > { %v1125_v45 = vpop.eup %1124 }
  0x3e   : > { %v645_v46 = vmul.f32 %v1125_v45, %v643_v44 }
  0x40   : > { %v646_v47 = vmul.f32 %v1125_v45, %v645_v46 }
  0x42   : > { %v647_v48 = vmul.f32 0.5, %v646_v47 }
  0x44   : > { %v648_v49 = vsub.f32 1.5, %v647_v48 }
  0x46   : > { %v649_v50 = vmul.f32 %v1125_v45, %v648_v49 }
  0x48   : > { %v650_v51 = vmul.f32 %v649_v50, %v643_v44 }
  0x4a   : > { %v652_v53 = vsel %vm651_vm1, %v643_v44, %v650_v51 }
  0x4b   : > { %v655_v54 = vsel %vm653_vm2, %v654_v52, %v652_v53  ;;  %v799_v52 = vld [vmem:[%s1374_s9] sm:$0xf] }
  0x4c   : > { %v656_v55 = vadd.f32 106.0, %v655_v54  ;;  %v800_v53 = vld [vmem:[%s1375_s10] sm:$0xf] }
  0x4e   : > { %1126 = vrcp.f32 %v656_v55 }
  0x54   : > { %v1127_v58 = vpop.eup %1126 }
  0x55   : > { %v674_v59 = vmul.f32 %v1127_v58, %v625_v26  ;;  %v658_v63 = vmul.f32 %v1127_v58, %v624_v25 }
  0x6e   : > { %v764_v19 = vpop.permute.xlu2 %763 }
  0x76   : > { %v788_v40 = vpop.permute.xlu2 %787 }
  0x80   : > { %v663_v60 = vpop.permute.xlu0 %662  ;;  %v680_v62 = vpop.permute.xlu1 %679 }
  0x81   : > { %v675_v61 = vmul.f32 %v674_v59, %v663_v60  ;;  %v665_v2 = vmul.f32 %v663_v60, %v658_v63 }
  0x83   : > { %v682_v0 = vadd.f32 %v680_v62, %v675_v61 }
  0x85   : > { %v683_v1 = vpack.c.bf16 %v682_v0, %v682_v0 }
  0x87   : > { %v711_v3 = vsel %vm690_vm3, %v683_v1, 0 }
  0x88   : > { %v670_v4 = vpop.permute.xlu0 %669  ;;  %720 = vmatpush.bf16.msra.mxu1 %v711_v3  ;;  %741 = vmatpush.bf16.msra.mxu2 %v711_v3  ;;  %v731_v17 = vpop.permute.xlu1 %730 }
  0x89   : > { %v672_v9 = vadd.f32 %v670_v4, %v665_v2 }
  0x8b   : > { %v673_v10 = vpack.c.bf16 %v672_v9, %v672_v9  ;;  %1085 = vmatmul.msk.bf16.vlgmr.msra.gmra.mxu2 %vm686_vm4, %v684_v5  ;;  %1084 = vmatmul.msk.bf16.vlgmr.msra.gmra.mxu1 %vm686_vm4, %v685_v6 }
  0x8d   : > { %v692_v11 = vsel %vm690_vm3, %v673_v10, 0 }
  0x8e   : > { %701 = vmatpush.bf16.msra.mxu0 %v692_v11  ;;  %754 = vmatpush.bf16.msra.mxu3 %v692_v11 }
  0x90   : > { %v844_v57 = vpop.permute.xlu0 %843  ;;  %v877_v0 = vpop.permute.xlu1 %876 }
  0x91   : > { %1083 = vmatmul.msk.bf16.vlgmr.msra.gmra.mxu0 %vm686_vm4, %v684_v5  ;;  %1086 = vmatmul.msk.bf16.vlgmr.msra.gmra.mxu3 %vm686_vm4, %v685_v6 }
 0x108   : > { %v722_v12 = vpop.f32.mrf.mxu1 }
 0x10e   : > { %v703_v13 = vpop.f32.mrf.mxu0  ;;  %v743_v14 = vpop.f32.mrf.mxu2 }
 0x10f   : > { %v726_v16 = vsub.f32 %v703_v13, %v722_v12 }
 0x110   : > { %v724_v15 = vpop.f32.mrf.mxu1 }
 0x111   : > { %v733_v20 = vadd.f32 %v731_v17, %v726_v16 }
 0x113   : > { %v767_v25 = vmul.f32 %v733_v20, %v733_v20 }
 0x114   : > { %v756_v18 = vpop.f32.mrf.mxu3 }
 0x115   : > { %v757_v21 = vadd.f32 %v756_v18, %v743_v14  ;;  %v897_v14 = vld [vmem:[%s1378_s13] sm:$0xf] }
 0x116   : > { %v705_v22 = vpop.f32.mrf.mxu0  ;;  %v745_v23 = vpop.f32.mrf.mxu2  ;;  %v898_v17 = vunpack.c.l.bf16 %v897_v14 }
 0x117   : > { %v766_v24 = vadd.f32 %v764_v19, %v757_v21 }
 0x119   : > { %v768_v26 = vmul.f32 %v766_v24, %v766_v24 }
 0x11b   : > { %v769_v27 = vadd.f32 %v768_v26, %v767_v25 }
 0x11c   : > { %v758_v28 = vpop.f32.mrf.mxu3 }
 0x11d   : > { %1128 = vrsqrt.f32 %v769_v27  ;;  %vm777_vm5 = vcmp.eq.f32.partialorder %v769_v27, inf  ;;  %v780_v36 = vand.u32 2147483648, %v769_v27  ;;  %vm779_vm6 = vcmp.eq.f32.partialorder %v769_v27, 0.0  ;;  %v922_v28 = vld [vmem:[%s1379_s14] sm:$0xf] }
 0x123   : > { %v1129_v29 = vpop.eup %1128 }
 0x124   : > { %v771_v30 = vmul.f32 %v1129_v29, %v769_v27 }
 0x126   : > { %v772_v31 = vmul.f32 %v1129_v29, %v771_v30 }
 0x128   : > { %v773_v32 = vmul.f32 0.5, %v772_v31 }
 0x12a   : > { %v774_v33 = vsub.f32 1.5, %v773_v32 }
 0x12c   : > { %v775_v34 = vmul.f32 %v1129_v29, %v774_v33  ;;  %v924_v29 = vld [vmem:[%s1380_s15] sm:$0xf]  ;;  %v923_v33 = vunpack.c.l.bf16 %v922_v28 }
 0x12e   : > { %v776_v35 = vmul.f32 %v775_v34, %v769_v27 }
 0x130   : > { %v778_v37 = vsel %vm777_vm5, %v769_v27, %v776_v35 }
 0x131   : > { %v781_v38 = vsel %vm779_vm6, %v780_v36, %v778_v37  ;;  %v925_v36 = vunpack.c.l.bf16 %v924_v29 }
 0x132   : > { %vm782_vm7 = vcmp.gt.f32.partialorder %v781_v38, 0.0  ;;  %v790_v41 = vadd.f32 %v788_v40, %v781_v38 }
 0x133   : > { %v783_v39 = vsel %vm782_vm7, %v781_v38, 1.0  ;;  %v794_v45 = vsel %vm782_vm7, %v733_v20, 1.0 }
 0x134   : > { %1130 = vrcp.f32 %v783_v39  ;;  %v791_v42 = vmax.f32 %v790_v41, 0.0 }
 0x13a   : > { %v1131_v43 = vpop.eup %1130 }
 0x13b   : > { %v793_v44 = vmul.f32 %v1131_v43, %v791_v42 }
 0x13d   : > { %v795_v46 = vmul.f32 %v794_v45, %v793_v44  ;;  %v797_v47 = vmul.f32 %v793_v44, %v766_v24 }
 0x13f   : > { %v796_v48 = vpack.c.bf16 %v795_v46, %v795_v46  ;;  %v798_v49 = vpack.c.bf16 %v797_v47, %v797_v47 }
 0x141   : > { %v805_v50 = vsel %vm690_vm3, %v796_v48, 0  ;;  %v824_v51 = vsel %vm690_vm3, %v798_v49, 0 }
 0x142   : > { %814 = vmatpush.bf16.msrb.mxu0 %v805_v50  ;;  %833 = vmatpush.bf16.msrb.mxu1 %v824_v51 }
 0x143   : > { %854 = vmatpush.bf16.msrb.mxu2 %v824_v51  ;;  %867 = vmatpush.bf16.msrb.mxu3 %v805_v50 }
 0x145   : > { %1087 = vmatmul.msk.bf16.vlgmr.msrb.gmra.mxu0 %vm686_vm4, %v799_v52  ;;  %1088 = vmatmul.msk.bf16.vlgmr.msrb.gmra.mxu1 %vm686_vm4, %v800_v53 }
 0x146   : > { %1089 = vmatmul.msk.bf16.vlgmr.msrb.gmra.mxu2 %vm686_vm4, %v799_v52  ;;  %1090 = vmatmul.msk.bf16.vlgmr.msrb.gmra.mxu3 %vm686_vm4, %v800_v53 }
 0x1c2   : > { %v816_v54 = vpop.f32.mrf.mxu0  ;;  %v835_v55 = vpop.f32.mrf.mxu1 }
 0x1c3   : > { %v839_v56 = vsub.f32 %v816_v54, %v835_v55 }
 0x1c5   : > { %v846_v60 = vadd.f32 %v844_v57, %v839_v56 }
 0x1c7   : > { %v880_v2 = vmul.f32 %v846_v60, %v846_v60 }
 0x1c9   : > { %v856_v58 = vpop.f32.mrf.mxu2  ;;  %v869_v59 = vpop.f32.mrf.mxu3 }
 0x1ca   : > { %v870_v61 = vadd.f32 %v869_v59, %v856_v58  ;;  %v818_v62 = vpop.f32.mrf.mxu0  ;;  %v837_v63 = vpop.f32.mrf.mxu1 }
 0x1cc   : > { %v879_v1 = vadd.f32 %v877_v0, %v870_v61 }
 0x1ce   : > { %v881_v3 = vmul.f32 %v879_v1, %v879_v1  ;;  %v927_v42 = vmul.f32 %v925_v36, %v879_v1  ;;  %v930_v43 = vmul.f32 %v923_v33, %v879_v1 }
 0x1d0   : > { %v882_v4 = vadd.f32 %v881_v3, %v880_v2 }
 0x1d1   : > { %v858_v5 = vpop.f32.mrf.mxu2  ;;  %v871_v6 = vpop.f32.mrf.mxu3 }
 0x1d2   : > { %1132 = vrsqrt.f32 %v882_v4  ;;  %vm890_vm8 = vcmp.eq.f32.partialorder %v882_v4, inf  ;;  %v893_v18 = vand.u32 2147483648, %v882_v4  ;;  %vm892_vm9 = vcmp.eq.f32.partialorder %v882_v4, 0.0 }
 0x1d8   : > { %v1133_v9 = vpop.eup %1132 }
 0x1d9   : > { %v884_v10 = vmul.f32 %v1133_v9, %v882_v4 }
 0x1db   : > { %v885_v11 = vmul.f32 %v1133_v9, %v884_v10 }
 0x1dd   : > { %v886_v12 = vmul.f32 0.5, %v885_v11 }
 0x1df   : > { %v887_v13 = vsub.f32 1.5, %v886_v12 }
 0x1e1   : > { %v888_v15 = vmul.f32 %v1133_v9, %v887_v13 }
 0x1e3   : > { %v889_v16 = vmul.f32 %v888_v15, %v882_v4 }
 0x1e5   : > { %v891_v19 = vsel %vm890_vm8, %v882_v4, %v889_v16 }
 0x1e6   : > { %v894_v20 = vsel %vm892_vm9, %v893_v18, %v891_v19 }
 0x1e7   : > { %v899_v21 = vadd.f32 %v898_v17, %v894_v20  ;;  %vm895_vm10 = vcmp.gt.f32.partialorder %v894_v20, 0.0 }
 0x1e8   : > { %v896_v26 = vsel %vm895_vm10, %v894_v20, 1.0  ;;  %v921_v32 = vsel %vm895_vm10, %v846_v60, 1.0 }
 0x1e9   : > { %v1091_v22 = vmul.f32 -1.442695, %v899_v21  ;;  %v926_v38 = vmul.f32 %v923_v33, %v921_v32  ;;  %v931_v39 = vmul.f32 %v925_v36, %v921_v32 }
 0x1eb   : > { %1134 = vpow2.f32 %v1091_v22  ;;  %v928_v47 = vsub.f32 %v926_v38, %v927_v42  ;;  %v932_v48 = vadd.f32 %v931_v39, %v930_v43 }
 0x1f1   : > { %v1135_v23 = vpop.eup %1134 }
 0x1f2   : > { %v903_v24 = vadd.f32 1.0, %v1135_v23 }
 0x1f4   : > { %1136 = vrcp.f32 %v903_v24  ;;  %v915_v31 = vand.u32 2147483648, %v903_v24  ;;  %v913_v35 = vand.u32 2147483647, %v903_v24  ;;  %vm909_vm12 = vweird.f32 %v903_v24 }
 0x1f5   : > { %1138 = vrcp.f32 %v896_v26 }
 0x1f6   : > { %v916_v40 = vor.u32 1.1754944e-38, %v915_v31  ;;  %vm914_vm14 = vcmp.eq.f32.partialorder %v913_v35, 8.507059e+37 }
 0x1fa   : > { %v1137_v25 = vpop.eup %1136 }
 0x1fb   : > { %v905_v27 = vmul.f32 %v1137_v25, %v903_v24  ;;  %vm910_vm11 = vweird.f32 %v1137_v25  ;;  %v1139_v44 = vpop.eup %1138 }
 0x1fc   : > { %vm911_vm13 = vmor %vm909_vm12, %vm910_vm11 }
 0x1fd   : > { %v906_v30 = vsub.f32 1.0, %v905_v27 }
 0x1ff   : > { %v907_v34 = vmul.f32 %v1137_v25, %v906_v30 }
 0x201   : > { %v908_v37 = vadd.f32 %v1137_v25, %v907_v34 }
 0x203   : > { %v912_v41 = vsel %vm911_vm13, %v1137_v25, %v908_v37 }
 0x204   : > { %v917_v45 = vsel %vm914_vm14, %v916_v40, %v912_v41 }
 0x205   : > { %v920_v46 = vmul.f32 %v1139_v44, %v917_v45 }
 0x207   : > { %v929_v49 = vmul.f32 %v928_v47, %v920_v46  ;;  %v933_v50 = vmul.f32 %v932_v48, %v920_v46 }
 0x209   : > { %v934_v51 = vmul.f32 %v929_v49, %v1294_v7  ;;  %v935_v52 = vmul.f32 %v933_v50, %v1296_v8  ;;  %v938_v53 = vmul.f32 %v933_v50, %v1294_v7  ;;  %v939_v54 = vmul.f32 %v929_v49, %v1296_v8 }
 0x20b   : > { %v936_v55 = vsub.f32 %v934_v51, %v935_v52  ;;  %v940_v56 = vadd.f32 %v939_v54, %v938_v53 }
 0x20d   : > { %937 = vst.msk [vmem:[%s603_s0] sm:$0xff] %vm607_vm0, %v936_v55 }
 0x20e   : > { %941 = vst.msk [vmem:[%s603_s0 + $0x8] sm:$0xff] %vm607_vm0, %v940_v56 }
 0x20f PF: > { %s26_s23 = sadd.s32 1, %s1162_s23   ;;  %s1384_s21 = smov %s1158_s22 }
 0x210   : > { %p23_p5 = scmp.ge.s32.totalorder %s26_s23, 4   ;;  %s1385_s22 = smov %s1387_s24 }
 0x212   :  { %25 = sbr.rel (!%p23_p5) target bundleno = 2 (0x2), region = 123 }

// kernel: reverse.0
= control target key start
LH: loop header
LB: loop body
LE: loop exit
PB: predicated region body
PF: predicated region fallthrough
CT: control target
= control target key end

     0   :  { %v104_v10 = vlaneseq  ;;  %v97_v14 = vld [vmem:[#allocation0 + $0x7] ss:$-1 sm:$0xff]  ;;  %v111_v19 = vld [vmem:[#allocation0 + $0x17] ss:$-1 sm:$0xff]  ;;  %s606_s0 = inlined_call_operand.vmem [shape: f32[2,8,16,7], index: 0, kind: input, shape index: {}]   ;;  %s607_s1 = inlined_call_operand.vmem [shape: f32[2,8,16,7], index: 1, kind: output, shape index: {}]  }
   0x1   :  { %v61_v0 = vld [vmem:[%s606_s0] sm:$0xff]  ;;  %v63_v1 = vld [vmem:[%s606_s0 + $0x8] sm:$0xff]  ;;  %v65_v2 = vld [vmem:[%s606_s0 + $0x10] sm:$0xff]  ;;  %v98_v21 = vrot.slane %v97_v14, 1  ;;  %v112_v25 = vrot.slane %v111_v19, 1 }
   0x2   :  { %62 = vst [vmem:[#allocation0 + $0x8] sm:$0xff] %v61_v0  ;;  %v67_v3 = vld [vmem:[%s606_s0 + $0x18] sm:$0xff]  ;;  %v69_v4 = vld [vmem:[%s606_s0 + $0x20] sm:$0xff]  ;;  %v71_v5 = vld [vmem:[%s606_s0 + $0x28] sm:$0xff]  ;;  %v517_v17 = vshrl.u32 %v104_v10, 7 }
   0x3   :  { %64 = vst [vmem:[#allocation0 + $0x18] sm:$0xff] %v63_v1  ;;  %v73_v6 = vld [vmem:[%s606_s0 + $0x30] sm:$0xff]  ;;  %v75_v7 = vld [vmem:[%s606_s0 + $0x38] sm:$0xff]  ;;  %v77_v8 = vld [vmem:[%s606_s0 + $0x40] sm:$0xff] }
   0x4   :  { %66 = vst [vmem:[#allocation0 + $0x28] sm:$0xff] %v65_v2  ;;  %v79_v9 = vld [vmem:[%s606_s0 + $0x48] sm:$0xff]  ;;  %v81_v11 = vld [vmem:[%s606_s0 + $0x50] sm:$0xff]  ;;  %v83_v12 = vld [vmem:[%s606_s0 + $0x58] sm:$0xff]  ;;  %vm106_vm0 = vcmp.lt.s32.totalorder %v517_v17, 7 }
   0x5   :  { %68 = vst [vmem:[#allocation0 + $0x38] sm:$0xff] %v67_v3  ;;  %v85_v13 = vld [vmem:[%s606_s0 + $0x60] sm:$0xff]  ;;  %v87_v15 = vld [vmem:[%s606_s0 + $0x68] sm:$0xff]  ;;  %v89_v18 = vld [vmem:[%s606_s0 + $0x70] sm:$0xff] }
   0x6   :  { %70 = vst [vmem:[#allocation0 + $0x48] sm:$0xff] %v69_v4  ;;  %v91_v20 = vld [vmem:[%s606_s0 + $0x78] sm:$0xff]  ;;  %v125_v24 = vld [vmem:[#allocation0 + $0x27] ss:$-1 sm:$0xff]  ;;  %v139_v28 = vld [vmem:[#allocation0 + $0x37] ss:$-1 sm:$0xff] }
   0x7   :  { %72 = vst [vmem:[#allocation0 + $0x58] sm:$0xff] %v71_v5  ;;  %v126_v29 = vrot.slane %v125_v24, 1  ;;  %v153_v32 = vld [vmem:[#allocation0 + $0x47] ss:$-1 sm:$0xff]  ;;  %v140_v33 = vrot.slane %v139_v28, 1 }
   0x8   :  { %74 = vst [vmem:[#allocation0 + $0x68] sm:$0xff] %v73_v6  ;;  %v167_v36 = vld [vmem:[#allocation0 + $0x57] ss:$-1 sm:$0xff]  ;;  %v154_v37 = vrot.slane %v153_v32, 1  ;;  %v181_v40 = vld [vmem:[#allocation0 + $0x67] ss:$-1 sm:$0xff] }
   0x9   :  { %76 = vst [vmem:[#allocation0 + $0x78] sm:$0xff] %v75_v7  ;;  %v102_v16 = vld [vmem:[#allocation0 + $0xf] ss:$-1 sm:$0xff]  ;;  %v168_v41 = vrot.slane %v167_v36, 1  ;;  %v195_v44 = vld [vmem:[#allocation0 + $0x77] ss:$-1 sm:$0xff] }
   0xa   :  { %78 = vst [vmem:[#allocation0 + $0x88] sm:$0xff] %v77_v8  ;;  %v116_v22 = vld [vmem:[#allocation0 + $0x1f] ss:$-1 sm:$0xff]  ;;  %v103_v23 = vrot.slane %v102_v16, 1  ;;  %v182_v45 = vrot.slane %v181_v40, 1  ;;  %v196_v49 = vrot.slane %v195_v44, 1 }
   0xb   :  { %80 = vst [vmem:[#allocation0 + $0x98] sm:$0xff] %v79_v9  ;;  %v130_v26 = vld [vmem:[#allocation0 + $0x2f] ss:$-1 sm:$0xff]  ;;  %v117_v27 = vrot.slane %v116_v22, 1  ;;  %v209_v48 = vld [vmem:[#allocation0 + $0x87] ss:$-1 sm:$0xff] }
   0xc   :  { %82 = vst [vmem:[#allocation0 + $0xa8] sm:$0xff] %v81_v11  ;;  %v144_v30 = vld [vmem:[#allocation0 + $0x3f] ss:$-1 sm:$0xff]  ;;  %v131_v31 = vrot.slane %v130_v26, 1  ;;  %v223_v52 = vld [vmem:[#allocation0 + $0x97] ss:$-1 sm:$0xff] }
   0xd   :  { %84 = vst [vmem:[#allocation0 + $0xb8] sm:$0xff] %v83_v12  ;;  %v158_v34 = vld [vmem:[#allocation0 + $0x4f] ss:$-1 sm:$0xff]  ;;  %v145_v35 = vrot.slane %v144_v30, 1  ;;  %v210_v53 = vrot.slane %v209_v48, 1  ;;  %v224_v57 = vrot.slane %v223_v52, 1 }
   0xe   :  { %86 = vst [vmem:[#allocation0 + $0xc8] sm:$0xff] %v85_v13  ;;  %v172_v38 = vld [vmem:[#allocation0 + $0x5f] ss:$-1 sm:$0xff]  ;;  %v159_v39 = vrot.slane %v158_v34, 1  ;;  %v237_v56 = vld [vmem:[#allocation0 + $0xa7] ss:$-1 sm:$0xff] }
   0xf   :  { %88 = vst [vmem:[#allocation0 + $0xd8] sm:$0xff] %v87_v15  ;;  %v186_v42 = vld [vmem:[#allocation0 + $0x6f] ss:$-1 sm:$0xff]  ;;  %v173_v43 = vrot.slane %v172_v38, 1  ;;  %v251_v60 = vld [vmem:[#allocation0 + $0xb7] ss:$-1 sm:$0xff] }
  0x10   :  { %90 = vst [vmem:[#allocation0 + $0xe8] sm:$0xff] %v89_v18  ;;  %v200_v46 = vld [vmem:[#allocation0 + $0x7f] ss:$-1 sm:$0xff]  ;;  %v187_v47 = vrot.slane %v186_v42, 1  ;;  %v238_v61 = vrot.slane %v237_v56, 1  ;;  %v252_v1 = vrot.slane %v251_v60, 1 }
  0x11   :  { %92 = vst [vmem:[#allocation0 + $0xf8] sm:$0xff] %v91_v20  ;;  %v214_v50 = vld [vmem:[#allocation0 + $0x8f] ss:$-1 sm:$0xff]  ;;  %v201_v51 = vrot.slane %v200_v46, 1  ;;  %v265_v0 = vld [vmem:[#allocation0 + $0xc7] ss:$-1 sm:$0xff] }
  0x12   :  { %99 = vst [vmem:[#allocation1] sm:$0xff] %v98_v21  ;;  %v228_v54 = vld [vmem:[#allocation0 + $0x9f] ss:$-1 sm:$0xff]  ;;  %v215_v55 = vrot.slane %v214_v50, 1  ;;  %v279_v4 = vld [vmem:[#allocation0 + $0xd7] ss:$-1 sm:$0xff] }
  0x13   :  { %107 = vst.msk [vmem:[#allocation1] sm:$0xff] %vm106_vm0, %v103_v23  ;;  %v242_v58 = vld [vmem:[#allocation0 + $0xaf] ss:$-1 sm:$0xff]  ;;  %v229_v59 = vrot.slane %v228_v54, 1  ;;  %v266_v5 = vrot.slane %v265_v0, 1  ;;  %v280_v9 = vrot.slane %v279_v4, 1 }
  0x14   :  { %113 = vst [vmem:[#allocation1 + $0x8] sm:$0xff] %v112_v25  ;;  %v256_v62 = vld [vmem:[#allocation0 + $0xbf] ss:$-1 sm:$0xff]  ;;  %v243_v63 = vrot.slane %v242_v58, 1  ;;  %v293_v8 = vld [vmem:[#allocation0 + $0xe7] ss:$-1 sm:$0xff] }
  0x15   :  { %121 = vst.msk [vmem:[#allocation1 + $0x8] sm:$0xff] %vm106_vm0, %v117_v27  ;;  %v270_v2 = vld [vmem:[#allocation0 + $0xcf] ss:$-1 sm:$0xff]  ;;  %v257_v3 = vrot.slane %v256_v62, 1  ;;  %v307_v12 = vld [vmem:[#allocation0 + $0xf7] ss:$-1 sm:$0xff] }
  0x16   :  { %127 = vst [vmem:[#allocation1 + $0x10] sm:$0xff] %v126_v29  ;;  %v284_v6 = vld [vmem:[#allocation0 + $0xdf] ss:$-1 sm:$0xff]  ;;  %v271_v7 = vrot.slane %v270_v2, 1  ;;  %v294_v13 = vrot.slane %v293_v8, 1  ;;  %v308_v16 = vrot.slane %v307_v12, 1 }
  0x17   :  { %135 = vst.msk [vmem:[#allocation1 + $0x10] sm:$0xff] %vm106_vm0, %v131_v31  ;;  %v298_v10 = vld [vmem:[#allocation0 + $0xef] ss:$-1 sm:$0xff]  ;;  %v285_v11 = vrot.slane %v284_v6, 1 }
  0x18   :  { %141 = vst [vmem:[#allocation1 + $0x18] sm:$0xff] %v140_v33  ;;  %v312_v14 = vld [vmem:[#allocation0 + $0xff] ss:$-1 sm:$0xff]  ;;  %v299_v15 = vrot.slane %v298_v10, 1 }
  0x19   :  { %149 = vst.msk [vmem:[#allocation1 + $0x18] sm:$0xff] %vm106_vm0, %v145_v35  ;;  %v313_v18 = vrot.slane %v312_v14, 1 }
  0x1a   :  { %155 = vst [vmem:[#allocation1 + $0x20] sm:$0xff] %v154_v37  ;;  %v376_v19 = vld [vmem:[#allocation1] sm:$0xff] }
  0x1b   :  { %163 = vst.msk [vmem:[#allocation1 + $0x20] sm:$0xff] %vm106_vm0, %v159_v39 }
  0x1c   :  { %169 = vst [vmem:[#allocation1 + $0x28] sm:$0xff] %v168_v41  ;;  %v378_v20 = vld [vmem:[#allocation1 + $0x8] sm:$0xff] }
  0x1d   :  { %177 = vst.msk [vmem:[#allocation1 + $0x28] sm:$0xff] %vm106_vm0, %v173_v43 }
  0x1e   :  { %183 = vst [vmem:[#allocation1 + $0x30] sm:$0xff] %v182_v45  ;;  %v380_v17 = vld [vmem:[#allocation1 + $0x10] sm:$0xff] }
  0x1f   :  { %191 = vst.msk [vmem:[#allocation1 + $0x30] sm:$0xff] %vm106_vm0, %v187_v47 }
  0x20   :  { %197 = vst [vmem:[#allocation1 + $0x38] sm:$0xff] %v196_v49  ;;  %v382_v21 = vld [vmem:[#allocation1 + $0x18] sm:$0xff] }
  0x21   :  { %205 = vst.msk [vmem:[#allocation1 + $0x38] sm:$0xff] %vm106_vm0, %v201_v51 }
  0x22   :  { %211 = vst [vmem:[#allocation1 + $0x40] sm:$0xff] %v210_v53  ;;  %v384_v22 = vld [vmem:[#allocation1 + $0x20] sm:$0xff] }
  0x23   :  { %219 = vst.msk [vmem:[#allocation1 + $0x40] sm:$0xff] %vm106_vm0, %v215_v55 }
  0x24   :  { %225 = vst [vmem:[#allocation1 + $0x48] sm:$0xff] %v224_v57  ;;  %v386_v23 = vld [vmem:[#allocation1 + $0x28] sm:$0xff] }
  0x25   :  { %233 = vst.msk [vmem:[#allocation1 + $0x48] sm:$0xff] %vm106_vm0, %v229_v59 }
  0x26   :  { %239 = vst [vmem:[#allocation1 + $0x50] sm:$0xff] %v238_v61  ;;  %v388_v24 = vld [vmem:[#allocation1 + $0x30] sm:$0xff] }
  0x27   :  { %247 = vst.msk [vmem:[#allocation1 + $0x50] sm:$0xff] %vm106_vm0, %v243_v63 }
  0x28   :  { %253 = vst [vmem:[#allocation1 + $0x58] sm:$0xff] %v252_v1  ;;  %v390_v25 = vld [vmem:[#allocation1 + $0x38] sm:$0xff] }
  0x29   :  { %261 = vst.msk [vmem:[#allocation1 + $0x58] sm:$0xff] %vm106_vm0, %v257_v3 }
  0x2a   :  { %267 = vst [vmem:[#allocation1 + $0x60] sm:$0xff] %v266_v5  ;;  %v392_v26 = vld [vmem:[#allocation1 + $0x40] sm:$0xff] }
  0x2b   :  { %275 = vst.msk [vmem:[#allocation1 + $0x60] sm:$0xff] %vm106_vm0, %v271_v7 }
  0x2c   :  { %281 = vst [vmem:[#allocation1 + $0x68] sm:$0xff] %v280_v9  ;;  %v394_v27 = vld [vmem:[#allocation1 + $0x48] sm:$0xff] }
  0x2d   :  { %289 = vst.msk [vmem:[#allocation1 + $0x68] sm:$0xff] %vm106_vm0, %v285_v11 }
  0x2e   :  { %295 = vst [vmem:[#allocation1 + $0x70] sm:$0xff] %v294_v13  ;;  %v396_v28 = vld [vmem:[#allocation1 + $0x50] sm:$0xff] }
  0x2f   :  { %303 = vst.msk [vmem:[#allocation1 + $0x70] sm:$0xff] %vm106_vm0, %v299_v15 }
  0x30   :  { %309 = vst [vmem:[#allocation1 + $0x78] sm:$0xff] %v308_v16  ;;  %v398_v29 = vld [vmem:[#allocation1 + $0x58] sm:$0xff] }
  0x31   :  { %317 = vst.msk [vmem:[#allocation1 + $0x78] sm:$0xff] %vm106_vm0, %v313_v18 }
  0x32   :  { %377 = vst [vmem:[%s607_s1] sm:$0xff] %v376_v19  ;;  %v400_v30 = vld [vmem:[#allocation1 + $0x60] sm:$0xff] }
  0x33   :  { %379 = vst [vmem:[%s607_s1 + $0x8] sm:$0xff] %v378_v20 }
  0x34   :  { %381 = vst [vmem:[%s607_s1 + $0x10] sm:$0xff] %v380_v17  ;;  %v402_v31 = vld [vmem:[#allocation1 + $0x68] sm:$0xff] }
  0x35   :  { %383 = vst [vmem:[%s607_s1 + $0x18] sm:$0xff] %v382_v21 }
  0x36   :  { %385 = vst [vmem:[%s607_s1 + $0x20] sm:$0xff] %v384_v22  ;;  %v404_v32 = vld [vmem:[#allocation1 + $0x70] sm:$0xff] }
  0x37   :  { %387 = vst [vmem:[%s607_s1 + $0x28] sm:$0xff] %v386_v23 }
  0x38   :  { %389 = vst [vmem:[%s607_s1 + $0x30] sm:$0xff] %v388_v24  ;;  %v406_v33 = vld [vmem:[#allocation1 + $0x78] sm:$0xff] }
  0x39   :  { %391 = vst [vmem:[%s607_s1 + $0x38] sm:$0xff] %v390_v25 }
  0x3a   :  { %393 = vst [vmem:[%s607_s1 + $0x40] sm:$0xff] %v392_v26 }
  0x3b   :  { %395 = vst [vmem:[%s607_s1 + $0x48] sm:$0xff] %v394_v27 }
  0x3c   :  { %397 = vst [vmem:[%s607_s1 + $0x50] sm:$0xff] %v396_v28 }
  0x3d   :  { %399 = vst [vmem:[%s607_s1 + $0x58] sm:$0xff] %v398_v29 }
  0x3e   :  { %401 = vst [vmem:[%s607_s1 + $0x60] sm:$0xff] %v400_v30 }
  0x3f   :  { %403 = vst [vmem:[%s607_s1 + $0x68] sm:$0xff] %v402_v31 }
  0x40   :  { %405 = vst [vmem:[%s607_s1 + $0x70] sm:$0xff] %v404_v32 }
  0x41   :  { %407 = vst [vmem:[%s607_s1 + $0x78] sm:$0xff] %v406_v33 }

// kernel: refno_block.5
= control target key start
LH: loop header
LB: loop body
LE: loop exit
PB: predicated region body
PF: predicated region fallthrough
CT: control target
= control target key end

     0   :  { %s235_s1 = inlined_call_operand.vmem [shape: bf16[128,128], index: 1, kind: input, shape index: {}]   ;;  %s236_s2 = inlined_call_operand.vmem [shape: f32[1,128], index: 2, kind: input, shape index: {}]   ;;  %s237_s0 = inlined_call_operand.vmem [shape: f32[32,128], index: 0, kind: input, shape index: {}]   ;;  %s238_s3 = inlined_call_operand.vmem [shape: f32[32,128], index: 3, kind: output, shape index: {}]  }
   0x1   :  { %v154_v0 = vld [vmem:[%s235_s1 + $0x38] sm:$0xff]  ;;  %v153_v1 = vld [vmem:[%s235_s1 + $0x30] sm:$0xff]  ;;  %v152_v2 = vld [vmem:[%s235_s1 + $0x28] sm:$0xff] }
   0x2   :  { %88 = vmatpush.bf16.msra.mxu0 %v154_v0  ;;  %155 = vmatpush.bf16.msra.mxu1 %v154_v0  ;;  %v151_v3 = vld [vmem:[%s235_s1 + $0x20] sm:$0xff]  ;;  %v150_v4 = vld [vmem:[%s235_s1 + $0x18] sm:$0xff]  ;;  %v149_v5 = vld [vmem:[%s235_s1 + $0x10] sm:$0xff] }
   0x3   :  { %v148_v6 = vld [vmem:[%s235_s1 + $0x8] sm:$0xff]  ;;  %v147_v7 = vld [vmem:[%s235_s1] sm:$0xff]  ;;  %v16_v10 = vld [vmem:[%s237_s0 + $0x10] sm:$0xff] }
   0x4   :  { %v14_v8 = vld [vmem:[%s237_s0] sm:$0xff]  ;;  %v15_v9 = vld [vmem:[%s237_s0 + $0x8] sm:$0xff]  ;;  %v17_v11 = vld [vmem:[%s237_s0 + $0x18] sm:$0xff] }
   0x5   :  { %v18_v12 = vpack.c.bf16 %v15_v9, %v14_v8  ;;  %v19_v13 = vpack.c.bf16 %v17_v11, %v16_v10  ;;  %v163_v14 = vld [vmem:[%s236_s2] ss:$0 sm:$0xff] }
   0x6   :  { %89 = vmatpush.bf16.msra.mxu0 %v153_v1  ;;  %156 = vmatpush.bf16.msra.mxu1 %v153_v1 }
   0xa   :  { %90 = vmatpush.bf16.msra.mxu0 %v152_v2  ;;  %157 = vmatpush.bf16.msra.mxu1 %v152_v2 }
   0xe   :  { %91 = vmatpush.bf16.msra.mxu0 %v151_v3  ;;  %158 = vmatpush.bf16.msra.mxu1 %v151_v3 }
  0x12   :  { %92 = vmatpush.bf16.msra.mxu0 %v150_v4  ;;  %159 = vmatpush.bf16.msra.mxu1 %v150_v4 }
  0x16   :  { %93 = vmatpush.bf16.msra.mxu0 %v149_v5  ;;  %160 = vmatpush.bf16.msra.mxu1 %v149_v5 }
  0x1a   :  { %94 = vmatpush.bf16.msra.mxu0 %v148_v6  ;;  %161 = vmatpush.bf16.msra.mxu1 %v148_v6 }
  0x1e   :  { %95 = vmatpush.bf16.msra.mxu0 %v147_v7  ;;  %162 = vmatpush.bf16.msra.mxu1 %v147_v7 }
  0x21   :  { %96 = vmatmul.bf16.vlgmr.msra.gmra.mxu0 %v18_v12  ;;  %101 = vmatmul.bf16.vlgmr.msra.gmra.mxu1 %v19_v13 }
  0x9e   :  { %v97_v15 = vpop.f32.mrf.mxu0  ;;  %v102_v16 = vpop.f32.mrf.mxu1 }
  0x9f   :  { %v98_v17 = vadd.f32 %v163_v14, %v97_v15  ;;  %v103_v18 = vadd.f32 %v163_v14, %v102_v16 }
  0xa1   :  { %107 = vst [vmem:[%s238_s3] sm:$0xff] %v98_v17 }
  0xa2   :  { %109 = vst [vmem:[%s238_s3 + $0x10] sm:$0xff] %v103_v18 }
  0xa6   :  { %v99_v19 = vpop.f32.mrf.mxu0  ;;  %v104_v20 = vpop.f32.mrf.mxu1 }
  0xa7   :  { %v100_v21 = vadd.f32 %v163_v14, %v99_v19  ;;  %v105_v22 = vadd.f32 %v163_v14, %v104_v20 }
  0xa9   :  { %108 = vst [vmem:[%s238_s3 + $0x8] sm:$0xff] %v100_v21 }
  0xaa   :  { %110 = vst [vmem:[%s238_s3 + $0x18] sm:$0xff] %v105_v22 }

</bundles_post_ra>
